<compile_context>
chip_gen: v5e
topology: v5e:2x2
jax: 0.10.0
libtpu: 0.0.40
codegen_flags: <defaults>
</compile_context>

<pallas_src>
import math

import jax
import jax.numpy as jnp
from jax.experimental import pallas as pl
from jax.experimental.pallas import tpu as pltpu


def _make_mha_kernel(n_heads, v_dim, tb, lqp, lkp, lk):
    ds = v_dim // n_heads
    eps = 1e-5
    f32 = jnp.float32
    rq = tb * lqp  # query rows in this block

    def kernel(q_ref, k_ref, v_ref,
               wqh_ref, bqh_ref, wkh_ref, bkh_ref, wvh_ref, bvh_ref,
               wo_ref, bo_ref, g1_ref, be1_ref, g2_ref, be2_ref,
               o_ref):
        # Key-padding score bias (only if Lk was padded to Lkp); built once,
        # broadcasts over (batch, query) in the per-head score add.
        if lkp != lk:
            kpos = jax.lax.broadcasted_iota(jnp.int32, (1, 1, lkp), 2)
            score_bias = jnp.where(kpos < lk, 0.0, -1e30).astype(f32)
        else:
            score_bias = None

        # ---- per-head attention, everything kept in values ----
        heads = []
        for h in range(n_heads):                      # small static unroll
            # Per-head projections: weights were pre-split per head in the
            # wrapper, so no lane slicing of activations is ever needed.  The
            # LHS is streamed from the input VMEM block each time (no big live
            # values held across the unrolled loop).
            qh = (jnp.dot(q_ref[...], wqh_ref[h], preferred_element_type=f32)
                  + bqh_ref[h]).reshape(tb, lqp, ds)
            kh = (jnp.dot(k_ref[...], wkh_ref[h], preferred_element_type=f32)
                  + bkh_ref[h]).reshape(tb, lkp, ds)   # 1/sqrt(v_dim) pre-folded
            vh = (jnp.dot(v_ref[...], wvh_ref[h], preferred_element_type=f32)
                  + bvh_ref[h]).reshape(tb, lkp, ds)

            # Batched contraction over the head dim -- no explicit kh transpose.
            s = jnp.einsum('bqd,bkd->bqk', qh, kh, preferred_element_type=f32)
            if score_bias is not None:
                s = s + score_bias
            s = s - jnp.max(s, axis=-1, keepdims=True)
            e = jnp.exp(s)
            # Divide-free softmax: exact EUP reciprocal + VPU multiply.
            a = e * pl.reciprocal(jnp.sum(e, axis=-1, keepdims=True), approx=False)
            oh = qh + jnp.einsum('bqk,bkd->bqd', a, vh, preferred_element_type=f32)
            heads.append(oh.reshape(rq, ds))

        att = jnp.concatenate(heads, axis=-1)          # single (rq, v_dim) value

        # ---- ln1 -> fc_o + relu residual -> ln2, one store at the very end ----
        def layer_norm(x, g, b):
            mu = jnp.mean(x, axis=-1, keepdims=True)
            d = x - mu
            var = jnp.mean(d * d, axis=-1, keepdims=True)
            return d * jax.lax.rsqrt(var + eps) * g + b

        o1 = layer_norm(att, g1_ref[...], be1_ref[...])
        u = jnp.dot(o1, wo_ref[...], preferred_element_type=f32) + bo_ref[...]
        o2 = o1 + jnp.maximum(u, 0.0)
        o_ref[...] = layer_norm(o2, g2_ref[...], be2_ref[...]).astype(o_ref.dtype)

    return kernel


def multi_head_attention(Q, K, V, params, n_heads, *, batch_tile=None):
    """Q: (B, Lq, q_dim), K/V: (B, Lk, k_dim) -> (B, Lq, v_dim)."""
    B, Lq, q_dim = Q.shape
    _, Lk, k_dim = K.shape
    v_dim = params["wq"].shape[1]
    assert v_dim % n_heads == 0
    ds = v_dim // n_heads

    Lqp = 8 * pl.cdiv(Lq, 8)            # sublane-aligned sequence lengths
    Lkp = 8 * pl.cdiv(Lk, 8)

    # Batch tile: target ~512 query rows per grid step (amortize per-step
    # overhead), but keep >= 2 grid steps when B >= 2 so the "parallel" grid
    # axis can use both TensorCores on v7x.
    if batch_tile is None:
        batch_tile = max(1, 512 // Lqp)
    TB = max(1, min(B, batch_tile))
    if B >= 2:
        TB = min(TB, pl.cdiv(B, 2))
    Bp = TB * pl.cdiv(B, TB)

    scale = 1.0 / math.sqrt(v_dim)      # module scales by sqrt(v_dim), not sqrt(head_dim)
    f32 = jnp.float32

    # Per-head weight/bias splits done wrapper-side (free relative to kernel
    # work): (in, v_dim) -> (n_heads, in, ds).  Score scale folded into fc_k.
    def per_head(w):
        lead = w.shape[0]
        return jnp.transpose(w.reshape(lead, n_heads, ds), (1, 0, 2)).astype(f32)

    wqh, bqh = per_head(params["wq"]), per_head(params["bq"])
    wkh, bkh = per_head(params["wk"] * scale), per_head(params["bk"] * scale)
    wvh, bvh = per_head(params["wv"]), per_head(params["bv"])
    wo = params["wo"].astype(f32)
    bo = params["bo"].astype(f32)
    g1, be1, g2, be2 = (params[n].astype(f32) for n in ("g1", "be1", "g2", "be2"))

    # Zero-pad batch / sequence to tile boundaries and flatten (b, l, d) ->
    # (b*l, d) in the wrapper, so every in-kernel reshape is a free
    # split/merge of the leading (sublane-aligned) axis.
    Qf = jnp.pad(Q, ((0, Bp - B), (0, Lqp - Lq), (0, 0))).reshape(Bp * Lqp, q_dim)
    Kf = jnp.pad(K, ((0, Bp - B), (0, Lkp - Lk), (0, 0))).reshape(Bp * Lkp, k_dim)
    Vf = jnp.pad(V, ((0, Bp - B), (0, Lkp - Lk), (0, 0))).reshape(Bp * Lkp, k_dim)

    kernel = _make_mha_kernel(n_heads, v_dim, TB, Lqp, Lkp, Lk)
    const = lambda a: pl.BlockSpec(a.shape, lambda b, _n=None, _a=a: (0,) * a.ndim)

    out = pl.pallas_call(
        kernel,
        out_shape=jax.ShapeDtypeStruct((Bp * Lqp, v_dim), Q.dtype),
        grid=(Bp // TB,),
        in_specs=[
            pl.BlockSpec((TB * Lqp, q_dim), lambda b: (b, 0)),
            pl.BlockSpec((TB * Lkp, k_dim), lambda b: (b, 0)),
            pl.BlockSpec((TB * Lkp, k_dim), lambda b: (b, 0)),
            const(wqh), const(bqh),            # fc_q (per-head split)
            const(wkh), const(bkh),            # fc_k (per-head split, pre-scaled)
            const(wvh), const(bvh),            # fc_v (per-head split)
            const(wo), const(bo),              # fc_o
            const(g1), const(be1),             # ln1 gamma/beta
            const(g2), const(be2),             # ln2 gamma/beta
        ],
        out_specs=pl.BlockSpec((TB * Lqp, v_dim), lambda b: (b, 0)),
        compiler_params=pltpu.CompilerParams(
            dimension_semantics=("parallel",),  # independent batch blocks -> both TCs on v7x
        ),
    )(Qf, Kf, Vf, wqh, bqh, wkh, bkh, wvh, bvh, wo, bo, g1, be1, g2, be2)

    # Batch/seq depad only; feature dim is already exactly v_dim (no slice copy
    # when B and Lq are already tile-aligned, as in the test below).
    return out.reshape(Bp, Lqp, v_dim)[:B, :Lq]


def _layer_norm(x, gamma, beta, eps=1e-5):
    mu = jnp.mean(x, axis=-1, keepdims=True)
    var = jnp.mean((x - mu) ** 2, axis=-1, keepdims=True)
    return (x - mu) * jax.lax.rsqrt(var + eps) * gamma + beta


def reference_mha(Q, K, V, params, n_heads):
    """Pure-JAX replica of the PyTorch forward (params=None branch)."""
    v_dim = params["wq"].shape[1]
    ds = v_dim // n_heads
    q = Q @ params["wq"] + params["bq"]
    k = K @ params["wk"] + params["bk"]
    v = V @ params["wv"] + params["bv"]
    outs = []
    for h in range(n_heads):
        qh = q[..., h * ds:(h + 1) * ds]
        kh = k[..., h * ds:(h + 1) * ds]
        vh = v[..., h * ds:(h + 1) * ds]
        a = jax.nn.softmax(jnp.einsum("bqd,bkd->bqk", qh, kh) / math.sqrt(v_dim), axis=-1)
        outs.append(qh + jnp.einsum("bqk,bkd->bqd", a, vh))
    O = jnp.concatenate(outs, axis=-1)
    O = _layer_norm(O, params["g1"], params["be1"])
    O = O + jnp.maximum(O @ params["wo"] + params["bo"], 0.0)
    O = _layer_norm(O, params["g2"], params["be2"])
    return O


if __name__ == "__main__":
    # Small, forward-consistent shapes (Lk=12 also exercises the key-pad mask).
    B, Lq, Lk = 2, 8, 12
    q_dim, k_dim, v_dim, n_heads = 16, 24, 32, 4

    key = jax.random.PRNGKey(0)
    ks = jax.random.split(key, 12)

    def init_w(k, shape):
        bound = 1.0 / math.sqrt(shape[0])
        return jax.random.uniform(k, shape, jnp.float32, -bound, bound)

    params = {
        "wq": init_w(ks[0], (q_dim, v_dim)), "bq": init_w(ks[1], (1, v_dim)),
        "wk": init_w(ks[2], (k_dim, v_dim)), "bk": init_w(ks[3], (1, v_dim)),
        "wv": init_w(ks[4], (k_dim, v_dim)), "bv": init_w(ks[5], (1, v_dim)),
        "wo": init_w(ks[6], (v_dim, v_dim)), "bo": init_w(ks[7], (1, v_dim)),
        # LayerNorm params at PyTorch defaults (ones / zeros).
        "g1": jnp.ones((1, v_dim), jnp.float32), "be1": jnp.zeros((1, v_dim), jnp.float32),
        "g2": jnp.ones((1, v_dim), jnp.float32), "be2": jnp.zeros((1, v_dim), jnp.float32),
    }

    Q = jax.random.normal(ks[8], (B, Lq, q_dim), jnp.float32)
    K = jax.random.normal(ks[9], (B, Lk, k_dim), jnp.float32)
    V = jax.random.normal(ks[10], (B, Lk, k_dim), jnp.float32)

    out = jax.block_until_ready(multi_head_attention(Q, K, V, params, n_heads))
    ref = reference_mha(Q, K, V, params, n_heads)

    assert out.shape == (B, Lq, v_dim)
    # All math is f32 with an exact softmax reciprocal; remaining differences
    # come only from MXU default-precision matmul rounding vs the XLA reference
    # (both well under the tolerance below).
    max_diff = float(jnp.max(jnp.abs(out - ref)))
    assert jnp.allclose(out, ref, atol=3e-2, rtol=3e-2), \
        f"mismatch vs reference, max|diff|={max_diff}"

    print("KERNEL_OK")
</pallas_src>

<mosaic_0001>
module attributes {stable_mosaic.version = 11 : i64} {
  func.func @kernel(%arg0: i32, %arg1: memref<8x16xf32, #tpu.memory_space<vmem>>, %arg2: memref<16x24xf32, #tpu.memory_space<vmem>>, %arg3: memref<16x24xf32, #tpu.memory_space<vmem>>, %arg4: memref<4x16x8xf32, #tpu.memory_space<vmem>>, %arg5: memref<4x1x8xf32, #tpu.memory_space<vmem>>, %arg6: memref<4x24x8xf32, #tpu.memory_space<vmem>>, %arg7: memref<4x1x8xf32, #tpu.memory_space<vmem>>, %arg8: memref<4x24x8xf32, #tpu.memory_space<vmem>>, %arg9: memref<4x1x8xf32, #tpu.memory_space<vmem>>, %arg10: memref<32x32xf32, #tpu.memory_space<vmem>>, %arg11: memref<1x32xf32, #tpu.memory_space<vmem>>, %arg12: memref<1x32xf32, #tpu.memory_space<vmem>>, %arg13: memref<1x32xf32, #tpu.memory_space<vmem>>, %arg14: memref<1x32xf32, #tpu.memory_space<vmem>>, %arg15: memref<1x32xf32, #tpu.memory_space<vmem>>, %arg16: memref<8x32xf32, #tpu.memory_space<vmem>>) attributes {dimension_semantics = [#tpu.dimension_semantics<parallel>], iteration_bounds = array<i64: 2>, scalar_prefetch = 0 : i64, scratch_operands = 0 : i64, tpu.core_type = #tpu.core_type<tc>, window_params = [{transform_indices = @transform_0, window_bounds = array<i64: 8, 16>}, {transform_indices = @transform_1, window_bounds = array<i64: 16, 24>}, {transform_indices = @transform_2, window_bounds = array<i64: 16, 24>}, {pipeline_mode = #tpu.pipeline_mode<synchronous>, transform_indices = @transform_3, window_bounds = array<i64: 4, 16, 8>}, {pipeline_mode = #tpu.pipeline_mode<synchronous>, transform_indices = @transform_4, window_bounds = array<i64: 4, 1, 8>}, {pipeline_mode = #tpu.pipeline_mode<synchronous>, transform_indices = @transform_5, window_bounds = array<i64: 4, 24, 8>}, {pipeline_mode = #tpu.pipeline_mode<synchronous>, transform_indices = @transform_6, window_bounds = array<i64: 4, 1, 8>}, {pipeline_mode = #tpu.pipeline_mode<synchronous>, transform_indices = @transform_7, window_bounds = array<i64: 4, 24, 8>}, {pipeline_mode = #tpu.pipeline_mode<synchronous>, transform_indices = @transform_8, window_bounds = array<i64: 4, 1, 8>}, {pipeline_mode = #tpu.pipeline_mode<synchronous>, transform_indices = @transform_9, window_bounds = array<i64: 32, 32>}, {pipeline_mode = #tpu.pipeline_mode<synchronous>, transform_indices = @transform_10, window_bounds = array<i64: 1, 32>}, {pipeline_mode = #tpu.pipeline_mode<synchronous>, transform_indices = @transform_11, window_bounds = array<i64: 1, 32>}, {pipeline_mode = #tpu.pipeline_mode<synchronous>, transform_indices = @transform_12, window_bounds = array<i64: 1, 32>}, {pipeline_mode = #tpu.pipeline_mode<synchronous>, transform_indices = @transform_13, window_bounds = array<i64: 1, 32>}, {pipeline_mode = #tpu.pipeline_mode<synchronous>, transform_indices = @transform_14, window_bounds = array<i64: 1, 32>}, {transform_indices = @transform_15, window_bounds = array<i64: 8, 32>}]} {
    %0 = tpu.iota {dimensions = array<i32: 2>} : vector<1x1x16xi32>
    %c12_i32 = arith.constant 12 : i32
    %1 = vector.broadcast %c12_i32 : i32 to vector<1x1x16xi32>
    %2 = arith.cmpi slt, %0, %1 : vector<1x1x16xi32>
    %cst = arith.constant 0.000000e+00 : f32
    %cst_0 = arith.constant -1.000000e+30 : f32
    %3 = vector.broadcast %cst : f32 to vector<1x1x16xf32>
    %4 = vector.broadcast %cst_0 : f32 to vector<1x1x16xf32>
    %5 = arith.select %2, %3, %4 : vector<1x1x16xi1>, vector<1x1x16xf32>
    %c0 = arith.constant 0 : index
    %c0_1 = arith.constant 0 : index
    %6 = vector.load %arg1[%c0, %c0_1] : memref<8x16xf32, #tpu.memory_space<vmem>>, vector<8x16xf32>
    %c0_2 = arith.constant 0 : index
    %c0_3 = arith.constant 0 : index
    %c0_4 = arith.constant 0 : index
    %7 = vector.load %arg4[%c0_2, %c0_3, %c0_4] : memref<4x16x8xf32, #tpu.memory_space<vmem>>, vector<1x16x8xf32>
    %8 = vector.shape_cast %7 : vector<1x16x8xf32> to vector<16x8xf32>
    %cst_5 = arith.constant dense<0.000000e+00> : vector<8x8xf32>
    %9 = tpu.matmul %6, %8, %cst_5 {dimension_numbers = #tpu.dot_dimension_numbers<[1], [0], [0], [1], [0, 0, 1, 1], [], []>} : vector<8x16xf32>, vector<16x8xf32>, vector<8x8xf32> -> vector<8x8xf32>
    %c0_6 = arith.constant 0 : index
    %c0_7 = arith.constant 0 : index
    %c0_8 = arith.constant 0 : index
    %10 = vector.load %arg5[%c0_6, %c0_7, %c0_8] : memref<4x1x8xf32, #tpu.memory_space<vmem>>, vector<1x1x8xf32>
    %11 = vector.shape_cast %10 : vector<1x1x8xf32> to vector<1x8xf32>
    %12 = vector.broadcast %11 : vector<1x8xf32> to vector<8x8xf32>
    %13 = arith.addf %9, %12 : vector<8x8xf32>
    %14 = vector.shape_cast %13 : vector<8x8xf32> to vector<1x8x8xf32>
    %c0_9 = arith.constant 0 : index
    %c0_10 = arith.constant 0 : index
    %15 = vector.load %arg2[%c0_9, %c0_10] : memref<16x24xf32, #tpu.memory_space<vmem>>, vector<16x24xf32>
    %c0_11 = arith.constant 0 : index
    %c0_12 = arith.constant 0 : index
    %c0_13 = arith.constant 0 : index
    %16 = vector.load %arg6[%c0_11, %c0_12, %c0_13] : memref<4x24x8xf32, #tpu.memory_space<vmem>>, vector<1x24x8xf32>
    %17 = vector.shape_cast %16 : vector<1x24x8xf32> to vector<24x8xf32>
    %cst_14 = arith.constant dense<0.000000e+00> : vector<16x8xf32>
    %18 = tpu.matmul %15, %17, %cst_14 {dimension_numbers = #tpu.dot_dimension_numbers<[1], [0], [0], [1], [0, 0, 1, 1], [], []>} : vector<16x24xf32>, vector<24x8xf32>, vector<16x8xf32> -> vector<16x8xf32>
    %c0_15 = arith.constant 0 : index
    %c0_16 = arith.constant 0 : index
    %c0_17 = arith.constant 0 : index
    %19 = vector.load %arg7[%c0_15, %c0_16, %c0_17] : memref<4x1x8xf32, #tpu.memory_space<vmem>>, vector<1x1x8xf32>
    %20 = vector.shape_cast %19 : vector<1x1x8xf32> to vector<1x8xf32>
    %21 = vector.broadcast %20 : vector<1x8xf32> to vector<16x8xf32>
    %22 = arith.addf %18, %21 : vector<16x8xf32>
    %23 = vector.shape_cast %22 : vector<16x8xf32> to vector<1x16x8xf32>
    %c0_18 = arith.constant 0 : index
    %c0_19 = arith.constant 0 : index
    %24 = vector.load %arg3[%c0_18, %c0_19] : memref<16x24xf32, #tpu.memory_space<vmem>>, vector<16x24xf32>
    %c0_20 = arith.constant 0 : index
    %c0_21 = arith.constant 0 : index
    %c0_22 = arith.constant 0 : index
    %25 = vector.load %arg8[%c0_20, %c0_21, %c0_22] : memref<4x24x8xf32, #tpu.memory_space<vmem>>, vector<1x24x8xf32>
    %26 = vector.shape_cast %25 : vector<1x24x8xf32> to vector<24x8xf32>
    %cst_23 = arith.constant dense<0.000000e+00> : vector<16x8xf32>
    %27 = tpu.matmul %24, %26, %cst_23 {dimension_numbers = #tpu.dot_dimension_numbers<[1], [0], [0], [1], [0, 0, 1, 1], [], []>} : vector<16x24xf32>, vector<24x8xf32>, vector<16x8xf32> -> vector<16x8xf32>
    %c0_24 = arith.constant 0 : index
    %c0_25 = arith.constant 0 : index
    %c0_26 = arith.constant 0 : index
    %28 = vector.load %arg9[%c0_24, %c0_25, %c0_26] : memref<4x1x8xf32, #tpu.memory_space<vmem>>, vector<1x1x8xf32>
    %29 = vector.shape_cast %28 : vector<1x1x8xf32> to vector<1x8xf32>
    %30 = vector.broadcast %29 : vector<1x8xf32> to vector<16x8xf32>
    %31 = arith.addf %27, %30 : vector<16x8xf32>
    %32 = vector.shape_cast %31 : vector<16x8xf32> to vector<1x16x8xf32>
    "tpu.trace_start"() <{level = 10 : i32, message = "bqd,bkd->bqk"}> : () -> ()
    %cst_27 = arith.constant dense<0.000000e+00> : vector<1x8x16xf32>
    %33 = tpu.matmul %14, %23, %cst_27 {dimension_numbers = #tpu.dot_dimension_numbers<[2], [2], [1], [1], [0, 0, 0, 1, 1, 1], [0], [0]>} : vector<1x8x8xf32>, vector<1x16x8xf32>, vector<1x8x16xf32> -> vector<1x8x16xf32>
    "tpu.trace_stop"() : () -> ()
    %34 = vector.broadcast %5 : vector<1x1x16xf32> to vector<1x8x16xf32>
    %35 = arith.addf %33, %34 : vector<1x8x16xf32>
    %cst_28 = arith.constant dense<0xFF800000> : vector<1x8xf32>
    %36 = vector.multi_reduction <maximumf>, %35, %cst_28 [2] : vector<1x8x16xf32> to vector<1x8xf32>
    %37 = vector.shape_cast %36 : vector<1x8xf32> to vector<1x8x1xf32>
    %38 = vector.broadcast %37 : vector<1x8x1xf32> to vector<1x8x16xf32>
    %39 = arith.subf %35, %38 : vector<1x8x16xf32>
    %40 = math.exp %39 : vector<1x8x16xf32>
    %cst_29 = arith.constant dense<0.000000e+00> : vector<1x8xf32>
    %41 = vector.multi_reduction <add>, %40, %cst_29 [2] : vector<1x8x16xf32> to vector<1x8xf32>
    %42 = vector.shape_cast %41 : vector<1x8xf32> to vector<1x8x1xf32>
    %43 = tpu.reciprocal %42 : vector<1x8x1xf32> -> vector<1x8x1xf32>
    %44 = vector.broadcast %43 : vector<1x8x1xf32> to vector<1x8x16xf32>
    %45 = arith.mulf %40, %44 : vector<1x8x16xf32>
    "tpu.trace_start"() <{level = 10 : i32, message = "bqk,bkd->bqd"}> : () -> ()
    %cst_30 = arith.constant dense<0.000000e+00> : vector<1x8x8xf32>
    %46 = tpu.matmul %45, %32, %cst_30 {dimension_numbers = #tpu.dot_dimension_numbers<[2], [1], [1], [2], [0, 0, 0, 1, 1, 2], [0], [0]>} : vector<1x8x16xf32>, vector<1x16x8xf32>, vector<1x8x8xf32> -> vector<1x8x8xf32>
    "tpu.trace_stop"() : () -> ()
    %47 = arith.addf %14, %46 : vector<1x8x8xf32>
    %48 = vector.shape_cast %47 : vector<1x8x8xf32> to vector<8x8xf32>
    %c0_31 = arith.constant 0 : index
    %c0_32 = arith.constant 0 : index
    %49 = vector.load %arg1[%c0_31, %c0_32] : memref<8x16xf32, #tpu.memory_space<vmem>>, vector<8x16xf32>
    %c1 = arith.constant 1 : index
    %c0_33 = arith.constant 0 : index
    %c0_34 = arith.constant 0 : index
    %50 = vector.load %arg4[%c1, %c0_33, %c0_34] : memref<4x16x8xf32, #tpu.memory_space<vmem>>, vector<1x16x8xf32>
    %51 = vector.shape_cast %50 : vector<1x16x8xf32> to vector<16x8xf32>
    %cst_35 = arith.constant dense<0.000000e+00> : vector<8x8xf32>
    %52 = tpu.matmul %49, %51, %cst_35 {dimension_numbers = #tpu.dot_dimension_numbers<[1], [0], [0], [1], [0, 0, 1, 1], [], []>} : vector<8x16xf32>, vector<16x8xf32>, vector<8x8xf32> -> vector<8x8xf32>
    %c1_36 = arith.constant 1 : index
    %c0_37 = arith.constant 0 : index
    %c0_38 = arith.constant 0 : index
    %53 = vector.load %arg5[%c1_36, %c0_37, %c0_38] : memref<4x1x8xf32, #tpu.memory_space<vmem>>, vector<1x1x8xf32>
    %54 = vector.shape_cast %53 : vector<1x1x8xf32> to vector<1x8xf32>
    %55 = vector.broadcast %54 : vector<1x8xf32> to vector<8x8xf32>
    %56 = arith.addf %52, %55 : vector<8x8xf32>
    %57 = vector.shape_cast %56 : vector<8x8xf32> to vector<1x8x8xf32>
    %c0_39 = arith.constant 0 : index
    %c0_40 = arith.constant 0 : index
    %58 = vector.load %arg2[%c0_39, %c0_40] : memref<16x24xf32, #tpu.memory_space<vmem>>, vector<16x24xf32>
    %c1_41 = arith.constant 1 : index
    %c0_42 = arith.constant 0 : index
    %c0_43 = arith.constant 0 : index
    %59 = vector.load %arg6[%c1_41, %c0_42, %c0_43] : memref<4x24x8xf32, #tpu.memory_space<vmem>>, vector<1x24x8xf32>
    %60 = vector.shape_cast %59 : vector<1x24x8xf32> to vector<24x8xf32>
    %cst_44 = arith.constant dense<0.000000e+00> : vector<16x8xf32>
    %61 = tpu.matmul %58, %60, %cst_44 {dimension_numbers = #tpu.dot_dimension_numbers<[1], [0], [0], [1], [0, 0, 1, 1], [], []>} : vector<16x24xf32>, vector<24x8xf32>, vector<16x8xf32> -> vector<16x8xf32>
    %c1_45 = arith.constant 1 : index
    %c0_46 = arith.constant 0 : index
    %c0_47 = arith.constant 0 : index
    %62 = vector.load %arg7[%c1_45, %c0_46, %c0_47] : memref<4x1x8xf32, #tpu.memory_space<vmem>>, vector<1x1x8xf32>
    %63 = vector.shape_cast %62 : vector<1x1x8xf32> to vector<1x8xf32>
    %64 = vector.broadcast %63 : vector<1x8xf32> to vector<16x8xf32>
    %65 = arith.addf %61, %64 : vector<16x8xf32>
    %66 = vector.shape_cast %65 : vector<16x8xf32> to vector<1x16x8xf32>
    %c0_48 = arith.constant 0 : index
    %c0_49 = arith.constant 0 : index
    %67 = vector.load %arg3[%c0_48, %c0_49] : memref<16x24xf32, #tpu.memory_space<vmem>>, vector<16x24xf32>
    %c1_50 = arith.constant 1 : index
    %c0_51 = arith.constant 0 : index
    %c0_52 = arith.constant 0 : index
    %68 = vector.load %arg8[%c1_50, %c0_51, %c0_52] : memref<4x24x8xf32, #tpu.memory_space<vmem>>, vector<1x24x8xf32>
    %69 = vector.shape_cast %68 : vector<1x24x8xf32> to vector<24x8xf32>
    %cst_53 = arith.constant dense<0.000000e+00> : vector<16x8xf32>
    %70 = tpu.matmul %67, %69, %cst_53 {dimension_numbers = #tpu.dot_dimension_numbers<[1], [0], [0], [1], [0, 0, 1, 1], [], []>} : vector<16x24xf32>, vector<24x8xf32>, vector<16x8xf32> -> vector<16x8xf32>
    %c1_54 = arith.constant 1 : index
    %c0_55 = arith.constant 0 : index
    %c0_56 = arith.constant 0 : index
    %71 = vector.load %arg9[%c1_54, %c0_55, %c0_56] : memref<4x1x8xf32, #tpu.memory_space<vmem>>, vector<1x1x8xf32>
    %72 = vector.shape_cast %71 : vector<1x1x8xf32> to vector<1x8xf32>
    %73 = vector.broadcast %72 : vector<1x8xf32> to vector<16x8xf32>
    %74 = arith.addf %70, %73 : vector<16x8xf32>
    %75 = vector.shape_cast %74 : vector<16x8xf32> to vector<1x16x8xf32>
    "tpu.trace_start"() <{level = 10 : i32, message = "bqd,bkd->bqk"}> : () -> ()
    %cst_57 = arith.constant dense<0.000000e+00> : vector<1x8x16xf32>
    %76 = tpu.matmul %57, %66, %cst_57 {dimension_numbers = #tpu.dot_dimension_numbers<[2], [2], [1], [1], [0, 0, 0, 1, 1, 1], [0], [0]>} : vector<1x8x8xf32>, vector<1x16x8xf32>, vector<1x8x16xf32> -> vector<1x8x16xf32>
    "tpu.trace_stop"() : () -> ()
    %77 = vector.broadcast %5 : vector<1x1x16xf32> to vector<1x8x16xf32>
    %78 = arith.addf %76, %77 : vector<1x8x16xf32>
    %cst_58 = arith.constant dense<0xFF800000> : vector<1x8xf32>
    %79 = vector.multi_reduction <maximumf>, %78, %cst_58 [2] : vector<1x8x16xf32> to vector<1x8xf32>
    %80 = vector.shape_cast %79 : vector<1x8xf32> to vector<1x8x1xf32>
    %81 = vector.broadcast %80 : vector<1x8x1xf32> to vector<1x8x16xf32>
    %82 = arith.subf %78, %81 : vector<1x8x16xf32>
    %83 = math.exp %82 : vector<1x8x16xf32>
    %cst_59 = arith.constant dense<0.000000e+00> : vector<1x8xf32>
    %84 = vector.multi_reduction <add>, %83, %cst_59 [2] : vector<1x8x16xf32> to vector<1x8xf32>
    %85 = vector.shape_cast %84 : vector<1x8xf32> to vector<1x8x1xf32>
    %86 = tpu.reciprocal %85 : vector<1x8x1xf32> -> vector<1x8x1xf32>
    %87 = vector.broadcast %86 : vector<1x8x1xf32> to vector<1x8x16xf32>
    %88 = arith.mulf %83, %87 : vector<1x8x16xf32>
    "tpu.trace_start"() <{level = 10 : i32, message = "bqk,bkd->bqd"}> : () -> ()
    %cst_60 = arith.constant dense<0.000000e+00> : vector<1x8x8xf32>
    %89 = tpu.matmul %88, %75, %cst_60 {dimension_numbers = #tpu.dot_dimension_numbers<[2], [1], [1], [2], [0, 0, 0, 1, 1, 2], [0], [0]>} : vector<1x8x16xf32>, vector<1x16x8xf32>, vector<1x8x8xf32> -> vector<1x8x8xf32>
    "tpu.trace_stop"() : () -> ()
    %90 = arith.addf %57, %89 : vector<1x8x8xf32>
    %91 = vector.shape_cast %90 : vector<1x8x8xf32> to vector<8x8xf32>
    %c0_61 = arith.constant 0 : index
    %c0_62 = arith.constant 0 : index
    %92 = vector.load %arg1[%c0_61, %c0_62] : memref<8x16xf32, #tpu.memory_space<vmem>>, vector<8x16xf32>
    %c2 = arith.constant 2 : index
    %c0_63 = arith.constant 0 : index
    %c0_64 = arith.constant 0 : index
    %93 = vector.load %arg4[%c2, %c0_63, %c0_64] : memref<4x16x8xf32, #tpu.memory_space<vmem>>, vector<1x16x8xf32>
    %94 = vector.shape_cast %93 : vector<1x16x8xf32> to vector<16x8xf32>
    %cst_65 = arith.constant dense<0.000000e+00> : vector<8x8xf32>
    %95 = tpu.matmul %92, %94, %cst_65 {dimension_numbers = #tpu.dot_dimension_numbers<[1], [0], [0], [1], [0, 0, 1, 1], [], []>} : vector<8x16xf32>, vector<16x8xf32>, vector<8x8xf32> -> vector<8x8xf32>
    %c2_66 = arith.constant 2 : index
    %c0_67 = arith.constant 0 : index
    %c0_68 = arith.constant 0 : index
    %96 = vector.load %arg5[%c2_66, %c0_67, %c0_68] : memref<4x1x8xf32, #tpu.memory_space<vmem>>, vector<1x1x8xf32>
    %97 = vector.shape_cast %96 : vector<1x1x8xf32> to vector<1x8xf32>
    %98 = vector.broadcast %97 : vector<1x8xf32> to vector<8x8xf32>
    %99 = arith.addf %95, %98 : vector<8x8xf32>
    %100 = vector.shape_cast %99 : vector<8x8xf32> to vector<1x8x8xf32>
    %c0_69 = arith.constant 0 : index
    %c0_70 = arith.constant 0 : index
    %101 = vector.load %arg2[%c0_69, %c0_70] : memref<16x24xf32, #tpu.memory_space<vmem>>, vector<16x24xf32>
    %c2_71 = arith.constant 2 : index
    %c0_72 = arith.constant 0 : index
    %c0_73 = arith.constant 0 : index
    %102 = vector.load %arg6[%c2_71, %c0_72, %c0_73] : memref<4x24x8xf32, #tpu.memory_space<vmem>>, vector<1x24x8xf32>
    %103 = vector.shape_cast %102 : vector<1x24x8xf32> to vector<24x8xf32>
    %cst_74 = arith.constant dense<0.000000e+00> : vector<16x8xf32>
    %104 = tpu.matmul %101, %103, %cst_74 {dimension_numbers = #tpu.dot_dimension_numbers<[1], [0], [0], [1], [0, 0, 1, 1], [], []>} : vector<16x24xf32>, vector<24x8xf32>, vector<16x8xf32> -> vector<16x8xf32>
    %c2_75 = arith.constant 2 : index
    %c0_76 = arith.constant 0 : index
    %c0_77 = arith.constant 0 : index
    %105 = vector.load %arg7[%c2_75, %c0_76, %c0_77] : memref<4x1x8xf32, #tpu.memory_space<vmem>>, vector<1x1x8xf32>
    %106 = vector.shape_cast %105 : vector<1x1x8xf32> to vector<1x8xf32>
    %107 = vector.broadcast %106 : vector<1x8xf32> to vector<16x8xf32>
    %108 = arith.addf %104, %107 : vector<16x8xf32>
    %109 = vector.shape_cast %108 : vector<16x8xf32> to vector<1x16x8xf32>
    %c0_78 = arith.constant 0 : index
    %c0_79 = arith.constant 0 : index
    %110 = vector.load %arg3[%c0_78, %c0_79] : memref<16x24xf32, #tpu.memory_space<vmem>>, vector<16x24xf32>
    %c2_80 = arith.constant 2 : index
    %c0_81 = arith.constant 0 : index
    %c0_82 = arith.constant 0 : index
    %111 = vector.load %arg8[%c2_80, %c0_81, %c0_82] : memref<4x24x8xf32, #tpu.memory_space<vmem>>, vector<1x24x8xf32>
    %112 = vector.shape_cast %111 : vector<1x24x8xf32> to vector<24x8xf32>
    %cst_83 = arith.constant dense<0.000000e+00> : vector<16x8xf32>
    %113 = tpu.matmul %110, %112, %cst_83 {dimension_numbers = #tpu.dot_dimension_numbers<[1], [0], [0], [1], [0, 0, 1, 1], [], []>} : vector<16x24xf32>, vector<24x8xf32>, vector<16x8xf32> -> vector<16x8xf32>
    %c2_84 = arith.constant 2 : index
    %c0_85 = arith.constant 0 : index
    %c0_86 = arith.constant 0 : index
    %114 = vector.load %arg9[%c2_84, %c0_85, %c0_86] : memref<4x1x8xf32, #tpu.memory_space<vmem>>, vector<1x1x8xf32>
    %115 = vector.shape_cast %114 : vector<1x1x8xf32> to vector<1x8xf32>
    %116 = vector.broadcast %115 : vector<1x8xf32> to vector<16x8xf32>
    %117 = arith.addf %113, %116 : vector<16x8xf32>
    %118 = vector.shape_cast %117 : vector<16x8xf32> to vector<1x16x8xf32>
    "tpu.trace_start"() <{level = 10 : i32, message = "bqd,bkd->bqk"}> : () -> ()
    %cst_87 = arith.constant dense<0.000000e+00> : vector<1x8x16xf32>
    %119 = tpu.matmul %100, %109, %cst_87 {dimension_numbers = #tpu.dot_dimension_numbers<[2], [2], [1], [1], [0, 0, 0, 1, 1, 1], [0], [0]>} : vector<1x8x8xf32>, vector<1x16x8xf32>, vector<1x8x16xf32> -> vector<1x8x16xf32>
    "tpu.trace_stop"() : () -> ()
    %120 = vector.broadcast %5 : vector<1x1x16xf32> to vector<1x8x16xf32>
    %121 = arith.addf %119, %120 : vector<1x8x16xf32>
    %cst_88 = arith.constant dense<0xFF800000> : vector<1x8xf32>
    %122 = vector.multi_reduction <maximumf>, %121, %cst_88 [2] : vector<1x8x16xf32> to vector<1x8xf32>
    %123 = vector.shape_cast %122 : vector<1x8xf32> to vector<1x8x1xf32>
    %124 = vector.broadcast %123 : vector<1x8x1xf32> to vector<1x8x16xf32>
    %125 = arith.subf %121, %124 : vector<1x8x16xf32>
    %126 = math.exp %125 : vector<1x8x16xf32>
    %cst_89 = arith.constant dense<0.000000e+00> : vector<1x8xf32>
    %127 = vector.multi_reduction <add>, %126, %cst_89 [2] : vector<1x8x16xf32> to vector<1x8xf32>
    %128 = vector.shape_cast %127 : vector<1x8xf32> to vector<1x8x1xf32>
    %129 = tpu.reciprocal %128 : vector<1x8x1xf32> -> vector<1x8x1xf32>
    %130 = vector.broadcast %129 : vector<1x8x1xf32> to vector<1x8x16xf32>
    %131 = arith.mulf %126, %130 : vector<1x8x16xf32>
    "tpu.trace_start"() <{level = 10 : i32, message = "bqk,bkd->bqd"}> : () -> ()
    %cst_90 = arith.constant dense<0.000000e+00> : vector<1x8x8xf32>
    %132 = tpu.matmul %131, %118, %cst_90 {dimension_numbers = #tpu.dot_dimension_numbers<[2], [1], [1], [2], [0, 0, 0, 1, 1, 2], [0], [0]>} : vector<1x8x16xf32>, vector<1x16x8xf32>, vector<1x8x8xf32> -> vector<1x8x8xf32>
    "tpu.trace_stop"() : () -> ()
    %133 = arith.addf %100, %132 : vector<1x8x8xf32>
    %134 = vector.shape_cast %133 : vector<1x8x8xf32> to vector<8x8xf32>
    %c0_91 = arith.constant 0 : index
    %c0_92 = arith.constant 0 : index
    %135 = vector.load %arg1[%c0_91, %c0_92] : memref<8x16xf32, #tpu.memory_space<vmem>>, vector<8x16xf32>
    %c3 = arith.constant 3 : index
    %c0_93 = arith.constant 0 : index
    %c0_94 = arith.constant 0 : index
    %136 = vector.load %arg4[%c3, %c0_93, %c0_94] : memref<4x16x8xf32, #tpu.memory_space<vmem>>, vector<1x16x8xf32>
    %137 = vector.shape_cast %136 : vector<1x16x8xf32> to vector<16x8xf32>
    %cst_95 = arith.constant dense<0.000000e+00> : vector<8x8xf32>
    %138 = tpu.matmul %135, %137, %cst_95 {dimension_numbers = #tpu.dot_dimension_numbers<[1], [0], [0], [1], [0, 0, 1, 1], [], []>} : vector<8x16xf32>, vector<16x8xf32>, vector<8x8xf32> -> vector<8x8xf32>
    %c3_96 = arith.constant 3 : index
    %c0_97 = arith.constant 0 : index
    %c0_98 = arith.constant 0 : index
    %139 = vector.load %arg5[%c3_96, %c0_97, %c0_98] : memref<4x1x8xf32, #tpu.memory_space<vmem>>, vector<1x1x8xf32>
    %140 = vector.shape_cast %139 : vector<1x1x8xf32> to vector<1x8xf32>
    %141 = vector.broadcast %140 : vector<1x8xf32> to vector<8x8xf32>
    %142 = arith.addf %138, %141 : vector<8x8xf32>
    %143 = vector.shape_cast %142 : vector<8x8xf32> to vector<1x8x8xf32>
    %c0_99 = arith.constant 0 : index
    %c0_100 = arith.constant 0 : index
    %144 = vector.load %arg2[%c0_99, %c0_100] : memref<16x24xf32, #tpu.memory_space<vmem>>, vector<16x24xf32>
    %c3_101 = arith.constant 3 : index
    %c0_102 = arith.constant 0 : index
    %c0_103 = arith.constant 0 : index
    %145 = vector.load %arg6[%c3_101, %c0_102, %c0_103] : memref<4x24x8xf32, #tpu.memory_space<vmem>>, vector<1x24x8xf32>
    %146 = vector.shape_cast %145 : vector<1x24x8xf32> to vector<24x8xf32>
    %cst_104 = arith.constant dense<0.000000e+00> : vector<16x8xf32>
    %147 = tpu.matmul %144, %146, %cst_104 {dimension_numbers = #tpu.dot_dimension_numbers<[1], [0], [0], [1], [0, 0, 1, 1], [], []>} : vector<16x24xf32>, vector<24x8xf32>, vector<16x8xf32> -> vector<16x8xf32>
    %c3_105 = arith.constant 3 : index
    %c0_106 = arith.constant 0 : index
    %c0_107 = arith.constant 0 : index
    %148 = vector.load %arg7[%c3_105, %c0_106, %c0_107] : memref<4x1x8xf32, #tpu.memory_space<vmem>>, vector<1x1x8xf32>
    %149 = vector.shape_cast %148 : vector<1x1x8xf32> to vector<1x8xf32>
    %150 = vector.broadcast %149 : vector<1x8xf32> to vector<16x8xf32>
    %151 = arith.addf %147, %150 : vector<16x8xf32>
    %152 = vector.shape_cast %151 : vector<16x8xf32> to vector<1x16x8xf32>
    %c0_108 = arith.constant 0 : index
    %c0_109 = arith.constant 0 : index
    %153 = vector.load %arg3[%c0_108, %c0_109] : memref<16x24xf32, #tpu.memory_space<vmem>>, vector<16x24xf32>
    %c3_110 = arith.constant 3 : index
    %c0_111 = arith.constant 0 : index
    %c0_112 = arith.constant 0 : index
    %154 = vector.load %arg8[%c3_110, %c0_111, %c0_112] : memref<4x24x8xf32, #tpu.memory_space<vmem>>, vector<1x24x8xf32>
    %155 = vector.shape_cast %154 : vector<1x24x8xf32> to vector<24x8xf32>
    %cst_113 = arith.constant dense<0.000000e+00> : vector<16x8xf32>
    %156 = tpu.matmul %153, %155, %cst_113 {dimension_numbers = #tpu.dot_dimension_numbers<[1], [0], [0], [1], [0, 0, 1, 1], [], []>} : vector<16x24xf32>, vector<24x8xf32>, vector<16x8xf32> -> vector<16x8xf32>
    %c3_114 = arith.constant 3 : index
    %c0_115 = arith.constant 0 : index
    %c0_116 = arith.constant 0 : index
    %157 = vector.load %arg9[%c3_114, %c0_115, %c0_116] : memref<4x1x8xf32, #tpu.memory_space<vmem>>, vector<1x1x8xf32>
    %158 = vector.shape_cast %157 : vector<1x1x8xf32> to vector<1x8xf32>
    %159 = vector.broadcast %158 : vector<1x8xf32> to vector<16x8xf32>
    %160 = arith.addf %156, %159 : vector<16x8xf32>
    %161 = vector.shape_cast %160 : vector<16x8xf32> to vector<1x16x8xf32>
    "tpu.trace_start"() <{level = 10 : i32, message = "bqd,bkd->bqk"}> : () -> ()
    %cst_117 = arith.constant dense<0.000000e+00> : vector<1x8x16xf32>
    %162 = tpu.matmul %143, %152, %cst_117 {dimension_numbers = #tpu.dot_dimension_numbers<[2], [2], [1], [1], [0, 0, 0, 1, 1, 1], [0], [0]>} : vector<1x8x8xf32>, vector<1x16x8xf32>, vector<1x8x16xf32> -> vector<1x8x16xf32>
    "tpu.trace_stop"() : () -> ()
    %163 = vector.broadcast %5 : vector<1x1x16xf32> to vector<1x8x16xf32>
    %164 = arith.addf %162, %163 : vector<1x8x16xf32>
    %cst_118 = arith.constant dense<0xFF800000> : vector<1x8xf32>
    %165 = vector.multi_reduction <maximumf>, %164, %cst_118 [2] : vector<1x8x16xf32> to vector<1x8xf32>
    %166 = vector.shape_cast %165 : vector<1x8xf32> to vector<1x8x1xf32>
    %167 = vector.broadcast %166 : vector<1x8x1xf32> to vector<1x8x16xf32>
    %168 = arith.subf %164, %167 : vector<1x8x16xf32>
    %169 = math.exp %168 : vector<1x8x16xf32>
    %cst_119 = arith.constant dense<0.000000e+00> : vector<1x8xf32>
    %170 = vector.multi_reduction <add>, %169, %cst_119 [2] : vector<1x8x16xf32> to vector<1x8xf32>
    %171 = vector.shape_cast %170 : vector<1x8xf32> to vector<1x8x1xf32>
    %172 = tpu.reciprocal %171 : vector<1x8x1xf32> -> vector<1x8x1xf32>
    %173 = vector.broadcast %172 : vector<1x8x1xf32> to vector<1x8x16xf32>
    %174 = arith.mulf %169, %173 : vector<1x8x16xf32>
    "tpu.trace_start"() <{level = 10 : i32, message = "bqk,bkd->bqd"}> : () -> ()
    %cst_120 = arith.constant dense<0.000000e+00> : vector<1x8x8xf32>
    %175 = tpu.matmul %174, %161, %cst_120 {dimension_numbers = #tpu.dot_dimension_numbers<[2], [1], [1], [2], [0, 0, 0, 1, 1, 2], [0], [0]>} : vector<1x8x16xf32>, vector<1x16x8xf32>, vector<1x8x8xf32> -> vector<1x8x8xf32>
    "tpu.trace_stop"() : () -> ()
    %176 = arith.addf %143, %175 : vector<1x8x8xf32>
    %177 = vector.shape_cast %176 : vector<1x8x8xf32> to vector<8x8xf32>
    %178 = tpu.concatenate %48, %91, %134, %177 in 1 : vector<8x8xf32>, vector<8x8xf32>, vector<8x8xf32>, vector<8x8xf32> -> vector<8x32xf32>
    %c0_121 = arith.constant 0 : index
    %c0_122 = arith.constant 0 : index
    %179 = vector.load %arg12[%c0_121, %c0_122] : memref<1x32xf32, #tpu.memory_space<vmem>>, vector<1x32xf32>
    %c0_123 = arith.constant 0 : index
    %c0_124 = arith.constant 0 : index
    %180 = vector.load %arg13[%c0_123, %c0_124] : memref<1x32xf32, #tpu.memory_space<vmem>>, vector<1x32xf32>
    %cst_125 = arith.constant dense<0.000000e+00> : vector<8xf32>
    %181 = vector.multi_reduction <add>, %178, %cst_125 [1] : vector<8x32xf32> to vector<8xf32>
    %182 = vector.shape_cast %181 : vector<8xf32> to vector<8x1xf32>
    %cst_126 = arith.constant 3.200000e+01 : f32
    %183 = vector.broadcast %cst_126 : f32 to vector<8x1xf32>
    %184 = arith.divf %182, %183 : vector<8x1xf32>
    %185 = vector.broadcast %184 : vector<8x1xf32> to vector<8x32xf32>
    %186 = arith.subf %178, %185 : vector<8x32xf32>
    %187 = arith.mulf %186, %186 : vector<8x32xf32>
    %cst_127 = arith.constant dense<0.000000e+00> : vector<8xf32>
    %188 = vector.multi_reduction <add>, %187, %cst_127 [1] : vector<8x32xf32> to vector<8xf32>
    %189 = vector.shape_cast %188 : vector<8xf32> to vector<8x1xf32>
    %cst_128 = arith.constant 3.200000e+01 : f32
    %190 = vector.broadcast %cst_128 : f32 to vector<8x1xf32>
    %191 = arith.divf %189, %190 : vector<8x1xf32>
    %cst_129 = arith.constant 9.99999974E-6 : f32
    %192 = vector.broadcast %cst_129 : f32 to vector<8x1xf32>
    %193 = arith.addf %191, %192 : vector<8x1xf32>
    %194 = math.rsqrt %193 : vector<8x1xf32>
    %195 = vector.broadcast %194 : vector<8x1xf32> to vector<8x32xf32>
    %196 = arith.mulf %186, %195 : vector<8x32xf32>
    %197 = vector.broadcast %179 : vector<1x32xf32> to vector<8x32xf32>
    %198 = arith.mulf %196, %197 : vector<8x32xf32>
    %199 = vector.broadcast %180 : vector<1x32xf32> to vector<8x32xf32>
    %200 = arith.addf %198, %199 : vector<8x32xf32>
    %c0_130 = arith.constant 0 : index
    %c0_131 = arith.constant 0 : index
    %201 = vector.load %arg10[%c0_130, %c0_131] : memref<32x32xf32, #tpu.memory_space<vmem>>, vector<32x32xf32>
    %cst_132 = arith.constant dense<0.000000e+00> : vector<8x32xf32>
    %202 = tpu.matmul %200, %201, %cst_132 {dimension_numbers = #tpu.dot_dimension_numbers<[1], [0], [0], [1], [0, 0, 1, 1], [], []>} : vector<8x32xf32>, vector<32x32xf32>, vector<8x32xf32> -> vector<8x32xf32>
    %c0_133 = arith.constant 0 : index
    %c0_134 = arith.constant 0 : index
    %203 = vector.load %arg11[%c0_133, %c0_134] : memref<1x32xf32, #tpu.memory_space<vmem>>, vector<1x32xf32>
    %204 = vector.broadcast %203 : vector<1x32xf32> to vector<8x32xf32>
    %205 = arith.addf %202, %204 : vector<8x32xf32>
    %cst_135 = arith.constant 0.000000e+00 : f32
    %206 = vector.broadcast %cst_135 : f32 to vector<8x32xf32>
    %207 = arith.maximumf %205, %206 : vector<8x32xf32>
    %208 = arith.addf %200, %207 : vector<8x32xf32>
    %c0_136 = arith.constant 0 : index
    %c0_137 = arith.constant 0 : index
    %209 = vector.load %arg14[%c0_136, %c0_137] : memref<1x32xf32, #tpu.memory_space<vmem>>, vector<1x32xf32>
    %c0_138 = arith.constant 0 : index
    %c0_139 = arith.constant 0 : index
    %210 = vector.load %arg15[%c0_138, %c0_139] : memref<1x32xf32, #tpu.memory_space<vmem>>, vector<1x32xf32>
    %cst_140 = arith.constant dense<0.000000e+00> : vector<8xf32>
    %211 = vector.multi_reduction <add>, %208, %cst_140 [1] : vector<8x32xf32> to vector<8xf32>
    %212 = vector.shape_cast %211 : vector<8xf32> to vector<8x1xf32>
    %cst_141 = arith.constant 3.200000e+01 : f32
    %213 = vector.broadcast %cst_141 : f32 to vector<8x1xf32>
    %214 = arith.divf %212, %213 : vector<8x1xf32>
    %215 = vector.broadcast %214 : vector<8x1xf32> to vector<8x32xf32>
    %216 = arith.subf %208, %215 : vector<8x32xf32>
    %217 = arith.mulf %216, %216 : vector<8x32xf32>
    %cst_142 = arith.constant dense<0.000000e+00> : vector<8xf32>
    %218 = vector.multi_reduction <add>, %217, %cst_142 [1] : vector<8x32xf32> to vector<8xf32>
    %219 = vector.shape_cast %218 : vector<8xf32> to vector<8x1xf32>
    %cst_143 = arith.constant 3.200000e+01 : f32
    %220 = vector.broadcast %cst_143 : f32 to vector<8x1xf32>
    %221 = arith.divf %219, %220 : vector<8x1xf32>
    %cst_144 = arith.constant 9.99999974E-6 : f32
    %222 = vector.broadcast %cst_144 : f32 to vector<8x1xf32>
    %223 = arith.addf %221, %222 : vector<8x1xf32>
    %224 = math.rsqrt %223 : vector<8x1xf32>
    %225 = vector.broadcast %224 : vector<8x1xf32> to vector<8x32xf32>
    %226 = arith.mulf %216, %225 : vector<8x32xf32>
    %227 = vector.broadcast %209 : vector<1x32xf32> to vector<8x32xf32>
    %228 = arith.mulf %226, %227 : vector<8x32xf32>
    %229 = vector.broadcast %210 : vector<1x32xf32> to vector<8x32xf32>
    %230 = arith.addf %228, %229 : vector<8x32xf32>
    %c0_145 = arith.constant 0 : index
    %c0_146 = arith.constant 0 : index
    %231 = vector.load %arg16[%c0_145, %c0_146] : memref<8x32xf32, #tpu.memory_space<vmem>>, vector<8x32xf32>
    tpu.vector_store %arg16[%c0_145, %c0_146], %230 {strides = array<i32>} : memref<8x32xf32, #tpu.memory_space<vmem>>, vector<8x32xf32>,
    return
  }
  func.func @transform_0(%arg0: i32) -> (i32, i32) {
    %c0_i32 = arith.constant 0 : i32
    %c0_i32_0 = arith.constant 0 : i32
    return %arg0, %c0_i32 : i32, i32
  }
  func.func @transform_1(%arg0: i32) -> (i32, i32) {
    %c0_i32 = arith.constant 0 : i32
    %c0_i32_0 = arith.constant 0 : i32
    return %arg0, %c0_i32 : i32, i32
  }
  func.func @transform_2(%arg0: i32) -> (i32, i32) {
    %c0_i32 = arith.constant 0 : i32
    %c0_i32_0 = arith.constant 0 : i32
    return %arg0, %c0_i32 : i32, i32
  }
  func.func @transform_3(%arg0: i32) -> (i32, i32, i32) {
    %c0_i32 = arith.constant 0 : i32
    %c0_i32_0 = arith.constant 0 : i32
    %c0_i32_1 = arith.constant 0 : i32
    %c0_i32_2 = arith.constant 0 : i32
    return %c0_i32, %c0_i32_0, %c0_i32_1 : i32, i32, i32
  }
  func.func @transform_4(%arg0: i32) -> (i32, i32, i32) {
    %c0_i32 = arith.constant 0 : i32
    %c0_i32_0 = arith.constant 0 : i32
    %c0_i32_1 = arith.constant 0 : i32
    %c0_i32_2 = arith.constant 0 : i32
    return %c0_i32, %c0_i32_0, %c0_i32_1 : i32, i32, i32
  }
  func.func @transform_5(%arg0: i32) -> (i32, i32, i32) {
    %c0_i32 = arith.constant 0 : i32
    %c0_i32_0 = arith.constant 0 : i32
    %c0_i32_1 = arith.constant 0 : i32
    %c0_i32_2 = arith.constant 0 : i32
    return %c0_i32, %c0_i32_0, %c0_i32_1 : i32, i32, i32
  }
  func.func @transform_6(%arg0: i32) -> (i32, i32, i32) {
    %c0_i32 = arith.constant 0 : i32
    %c0_i32_0 = arith.constant 0 : i32
    %c0_i32_1 = arith.constant 0 : i32
    %c0_i32_2 = arith.constant 0 : i32
    return %c0_i32, %c0_i32_0, %c0_i32_1 : i32, i32, i32
  }
  func.func @transform_7(%arg0: i32) -> (i32, i32, i32) {
    %c0_i32 = arith.constant 0 : i32
    %c0_i32_0 = arith.constant 0 : i32
    %c0_i32_1 = arith.constant 0 : i32
    %c0_i32_2 = arith.constant 0 : i32
    return %c0_i32, %c0_i32_0, %c0_i32_1 : i32, i32, i32
  }
  func.func @transform_8(%arg0: i32) -> (i32, i32, i32) {
    %c0_i32 = arith.constant 0 : i32
    %c0_i32_0 = arith.constant 0 : i32
    %c0_i32_1 = arith.constant 0 : i32
    %c0_i32_2 = arith.constant 0 : i32
    return %c0_i32, %c0_i32_0, %c0_i32_1 : i32, i32, i32
  }
  func.func @transform_9(%arg0: i32) -> (i32, i32) {
    %c0_i32 = arith.constant 0 : i32
    %c0_i32_0 = arith.constant 0 : i32
    %c0_i32_1 = arith.constant 0 : i32
    return %c0_i32, %c0_i32_0 : i32, i32
  }
  func.func @transform_10(%arg0: i32) -> (i32, i32) {
    %c0_i32 = arith.constant 0 : i32
    %c0_i32_0 = arith.constant 0 : i32
    %c0_i32_1 = arith.constant 0 : i32
    return %c0_i32, %c0_i32_0 : i32, i32
  }
  func.func @transform_11(%arg0: i32) -> (i32, i32) {
    %c0_i32 = arith.constant 0 : i32
    %c0_i32_0 = arith.constant 0 : i32
    %c0_i32_1 = arith.constant 0 : i32
    return %c0_i32, %c0_i32_0 : i32, i32
  }
  func.func @transform_12(%arg0: i32) -> (i32, i32) {
    %c0_i32 = arith.constant 0 : i32
    %c0_i32_0 = arith.constant 0 : i32
    %c0_i32_1 = arith.constant 0 : i32
    return %c0_i32, %c0_i32_0 : i32, i32
  }
  func.func @transform_13(%arg0: i32) -> (i32, i32) {
    %c0_i32 = arith.constant 0 : i32
    %c0_i32_0 = arith.constant 0 : i32
    %c0_i32_1 = arith.constant 0 : i32
    return %c0_i32, %c0_i32_0 : i32, i32
  }
  func.func @transform_14(%arg0: i32) -> (i32, i32) {
    %c0_i32 = arith.constant 0 : i32
    %c0_i32_0 = arith.constant 0 : i32
    %c0_i32_1 = arith.constant 0 : i32
    return %c0_i32, %c0_i32_0 : i32, i32
  }
  func.func @transform_15(%arg0: i32) -> (i32, i32) {
    %c0_i32 = arith.constant 0 : i32
    %c0_i32_0 = arith.constant 0 : i32
    return %arg0, %c0_i32 : i32, i32
  }
}

</mosaic_0001>

<bundles_post_ra>
// kernel: tpu_custom_call.1
= control target key start
LH: loop header
LB: loop body
LE: loop exit
PB: predicated region body
PF: predicated region fallthrough
CT: control target
= control target key end

     0   :  { %s2185_s0 = inlined_call_operand.vmem [shape: f32[16,16], index: 0, kind: input, shape index: {}]   ;;  %s2186_s1 = inlined_call_operand.vmem [shape: f32[32,24], index: 1, kind: input, shape index: {}]   ;;  %s2187_s2 = inlined_call_operand.vmem [shape: f32[32,24], index: 2, kind: input, shape index: {}]   ;;  %s2188_s3 = inlined_call_operand.vmem [shape: f32[4,16,8], index: 3, kind: input, shape index: {}]   ;;  %s2189_s4 = inlined_call_operand.vmem [shape: f32[4,1,8], index: 4, kind: input, shape index: {}]   ;;  %s2190_s5 = inlined_call_operand.vmem [shape: f32[4,24,8], index: 5, kind: input, shape index: {}]   ;;  %s2191_s6 = inlined_call_operand.vmem [shape: f32[4,1,8], index: 6, kind: input, shape index: {}]   ;;  %s2192_s7 = inlined_call_operand.vmem [shape: f32[4,24,8], index: 7, kind: input, shape index: {}]   ;;  %s2193_s8 = inlined_call_operand.vmem [shape: f32[4,1,8], index: 8, kind: input, shape index: {}]   ;;  %s2194_s9 = inlined_call_operand.vmem [shape: f32[32,32], index: 9, kind: input, shape index: {}]   ;;  %s2195_s10 = inlined_call_operand.vmem [shape: f32[1,32], index: 10, kind: input, shape index: {}]   ;;  %s2196_s11 = inlined_call_operand.vmem [shape: f32[1,32], index: 11, kind: input, shape index: {}]   ;;  %s2197_s12 = inlined_call_operand.vmem [shape: f32[1,32], index: 12, kind: input, shape index: {}]   ;;  %s2198_s13 = inlined_call_operand.vmem [shape: f32[1,32], index: 13, kind: input, shape index: {}]   ;;  %s2199_s14 = inlined_call_operand.vmem [shape: f32[1,32], index: 14, kind: input, shape index: {}]   ;;  %s2200_s15 = inlined_call_operand.hbm [shape: f32[16,32], index: 15, kind: output, shape index: {}]  }
   0x1   :  { %2206 = sst [smem:[#allocation10_spill]] %s2185_s0 }
   0x2   :  { %20 = vsyncpa [#allocation3], 0 }
   0x3   :  { %22 = vsyncpa [#allocation3 + $0x1], 0  ;;  %s1827_s18 = smov 0   ;;  %s1829_s19 = smov 0  }
   0x4   :  { %s1831_s20 = smov 0   ;;  %s1833_s21 = smov 0  }
   0x5 LB: > { %2207 = sst [smem:[#allocation5_spill]] %s1728_s18  ;;  %s1848_s22 = sadd.s32 4294967295, %s1740_s21   ;;  %s1740_s21 = sphi %s1833_s21, %s2217_s21   ;;  %s1736_s20 = sphi %s1831_s20, %s2219_s20   ;;  %s1732_s19 = sphi %s1829_s19, %s2221_s19   ;;  %s1728_s18 = sphi %s1827_s18, %s2220_s18  }
   0x6   : > { %2208 = sst [smem:[#allocation6_spill]] %s1736_s20  ;;  %s1511_s23 = sadd.s32 4294967294, %s1740_s21  }
   0x7   : > { %s1852_s24 = sadd.s32 1, %s1740_s21   ;;  %s365_s25 = sadd.s32 1, %s1736_s20 }
   0x8   : > { %2209 = sst [smem:[#allocation7_spill]] %s1852_s24  ;;  %s362_s26 = ssub.s32 %s1740_s21, %s1852_s24 }
   0x9   : > { %p375_p0 = scmp.ne.s32.totalorder %s1736_s20, %s1732_s19  ;;  %p363_p1 = scmp.eq.s32.totalorder %s362_s26, 0 }
   0xa   : > { %p376_p2 = scmp.eq.s32.totalorder %s1848_s22, 1  ;;  %p381_p3 = scmp.ne.s32.totalorder %s1732_s19, %s1728_s18 }
   0xb   : > { %p382_p4 = scmp.eq.s32.totalorder %s1511_s23, 1  ;;  %p1514_p7 = scmp.ge.s32.totalorder %s1740_s21, 1 }
   0xc   : > { %s1863_s27 = scalar_select %p363_p1, %s1736_s20, %s365_s25  }
   0xd   : > { %p1865_p5 = por %p376_p2, %p375_p0  ;;  %p1869_p6 = por %p382_p4, %p381_p3 }
   0xe   : > { %2210 = sst [smem:[#allocation8_spill]] %s1863_s27  ;;  %p461_p8 = scmp.lt.s32.totalorder %s1740_s21, 3 }
   0xf   : > { %s2212_s29 = scalar_select %p1869_p6, 1, 0 }
  0x10   : > { %p462_p9 = pnand %p1514_p7, %p461_p8 }
  0x11   : > { %2213 = sst [smem:[#allocation9_spill]] %s2212_s29  ;;  %s1517_s25 = sshll.u32 (!%p462_p9), %s1848_s22, 1 }
  0x12   : > { %465 = sbr.rel (%p462_p9) target bundleno = 3132 (0xc3c), region = 80  ;;  %p518_p10 = scmp.lt.s32.totalorder (!%p462_p9), %s1848_s22, 1 }
  0x13   : > { %p523_p11 = scmp.lt.s32.totalorder (!%p462_p9), %s1517_s25, 3  ;;  %s2214_s0 = sld [smem:[#allocation10_spill]] (!%p462_p9) }
  0x14   : > { %s1744_s16 = smov (!%p462_p9), 16   ;;  %s1745_s26 = smov (!%p462_p9), 24  }
  0x15   : > { %s1592_s18 = sshll.u32 (!%p462_p9), %s1848_s22, 3 }
  0x17   : > { %v573_v0 = vld [vmem:[%s2190_s5 + $0x10] sm:$0xff]  ;;  %v572_v1 = vld [vmem:[%s2190_s5 + $0x8] sm:$0xff]  ;;  %v539_v3 = vld [vmem:[%s2188_s3] sm:$0xff]  ;;  %s519_s29 = scalar_select %p518_p10, %s1848_s22, 1  ;;  %vm545_vm0 = vcmask 130048   ;;  %vm578_vm1 = vcmask 195584   ;;  %v534_v20 = vlaneseq }
  0x18   : > { %598 = vmatpush.msra.mxu1 %v573_v0  ;;  %v540_v2 = vld [vmem:[%s2188_s3 + $0x8] sm:$0xff]  ;;  %v571_v4 = vld [vmem:[%s2190_s5] sm:$0xff]  ;;  %s2223_s25 = smov (!%p523_p11, %s1517_s25), 3  ;;  %vm646_vm2 = vcmask 64512   ;;  %v612_v16 = vld [vmem:[%s2192_s7 + $0x10] sm:$0xff] }
  0x19   : > { %563 = vmatpush.msra.mxu0 %v540_v2  ;;  %s1516_s17 = sshll.u32 %s519_s29, 3  ;;  %s1518_s27 = sshll.u32 %s2223_s25, 3  ;;  %v1639_v9 = vld [vmem:[%s2191_s6] ss:$0 sm:$0xff]  ;;  %v611_v17 = vld [vmem:[%s2192_s7 + $0x8] sm:$0xff]  ;;  %636 = vmatpush.msra.mxu2 %v612_v16  ;;  %v535_v21 = vand.u32 127, %v534_v20 }
  0x1a   : > { %599 = vmatpush.msra.mxu1 %v572_v1  ;;  %s521_s20 = scalar_lea.vmem %s2214_s0, %s1516_s17  ;;  %s526_s30 = scalar_lea.vmem %s2186_s1, %s1518_s27  ;;  %v1640_v12 = vld [vmem:[%s2189_s4] ss:$0 sm:$0xff]  ;;  %v1742_v22 = vmov -1e+30   ;;  %v1536_v38 = vld [vmem:[%s2190_s5 + $0x28] sm:$0xff]  ;;  %v1534_v40 = vld [vmem:[%s2190_s5 + $0x18] sm:$0xff] }
  0x1b   : > { %564 = vmatpush.msra.mxu0 %v539_v3  ;;  %v1902_v5 = vld [vmem:[%s521_s20] sm:$0xff]  ;;  %v1910_v7 = vld [vmem:[%s526_s30 + $0x8] sm:$0xff]  ;;  %s532_s29 = scalar_lea.vmem %s2187_s2, %s1518_s27  ;;  %637 = vmatpush.msra.mxu2 %v611_v17  ;;  %vm536_vm3 = vcmp.lt.s32.totalorder %v535_v21, 12  ;;  %v1531_v41 = vld [vmem:[%s2188_s3 + $0x18] sm:$0xff]  ;;  %s1743_s27 = smov 8  }
  0x1c   : > { %600 = vmatpush.msra.mxu1 %v571_v4  ;;  %v1904_v6 = vld [vmem:[%s526_s30] sm:$0xff]  ;;  %1521 = vmatmul.msk.f32.vlgmr.msra.gmra.mxu0 %vm545_vm0, %v1902_v5  ;;  %v1942_v23 = vsel %vm536_vm3, 0.0, %v1742_v22  ;;  %v1946_v27 = vld [vmem:[%s532_s29 + $0x8] sm:$0xff]  ;;  %v1530_v42 = vld [vmem:[%s2188_s3 + $0x10] sm:$0xff] }
  0x1d   : > { %1522 = vmatmul.msk.f32.vlgmr.msra.gmra.mxu1 %vm578_vm1, %v1904_v6  ;;  %v610_v18 = vld [vmem:[%s2192_s7] sm:$0xff]  ;;  %v1542_v0 = vld [vmem:[%s2192_s7 + $0x28] sm:$0xff]  ;;  %v1540_v2 = vld [vmem:[%s2192_s7 + $0x18] sm:$0xff] }
  0x1e   : > { %v1938_v19 = vld [vmem:[%s532_s29] sm:$0xff]  ;;  %638 = vmatpush.msra.mxu2 %v610_v18  ;;  %826 = vmatpush.msrb.mxu1 %v1542_v0  ;;  %v1555_v22 = vld [vmem:[%s2190_s5 + $0x38] sm:$0xff]  ;;  %s515_s29 = sand.u32 1, %s1732_s19  }
  0x1f   : > { %1524 = vmatmul.msk.f32.vlgmr.msra.gmra.mxu2 %vm578_vm1, %v1938_v19  ;;  %v1641_v34 = vld [vmem:[%s2193_s8] ss:$0 sm:$0xff]  ;;  %v1642_v57 = vld [vmem:[%s2191_s6 + $0x1] ss:$0 sm:$0xff]  ;;  %v1647_v0 = vld [vmem:[%s2193_s8 + $0x2] ss:$0 sm:$0xff] }
  0x20   : > { %v1535_v39 = vld [vmem:[%s2190_s5 + $0x20] sm:$0xff]  ;;  %s1515_s25 = sshll.u32 %s515_s29, 3 }
  0x21   : > { %v1643_v60 = vld [vmem:[%s2189_s4 + $0x1] ss:$0 sm:$0xff]  ;;  %s517_s30 = scalar_lea.vmem [#allocation2], %s1515_s25  ;;  %s1698_s25 = scalar_lea.hbm %s2200_s15, 16 }
  0x22   : > { %v1541_v1 = vld [vmem:[%s2192_s7 + $0x20] sm:$0xff]  ;;  %s1425_s22 = sshll.u32 %s517_s30, 4  ;;  %s1426_s22 = int_to_ptr.vmem [resolvable:$true] %s1425_s22 }
  0x23   : > { %827 = vmatpush.msrb.mxu1 %v1541_v1  ;;  %v1644_v16 = vld [vmem:[%s2193_s8 + $0x1] ss:$0 sm:$0xff] }
  0x24   : > { %v1556_v21 = vld [vmem:[%s2190_s5 + $0x40] sm:$0xff] }
  0x25   : > { %1523 = vmatmul.msk.f32.gmra.mxu1 %vm578_vm1, %v1910_v7 }
  0x26   : > { %828 = vmatpush.msrb.mxu1 %v1540_v2 }
  0x27   : > { %1525 = vmatmul.msk.f32.gmra.mxu2 %vm578_vm1, %v1946_v27 }
  0x2d   : > { %1544 = vmatmul.msk.f32.vlgmr.msrb.gmra.mxu1 %vm578_vm1, %v1938_v19 }
  0x35   : > { %1545 = vmatmul.msk.f32.gmra.mxu1 %vm578_vm1, %v1946_v27 }
  0x99   : > { %v566_v13 = vpop.f32.mrf.mxu0 }
  0x9a   : > { %v602_v8 = vpop.f32.mrf.mxu1  ;;  %v1921_v15 = vadd.f32 %v1640_v12, %v566_v13 }
  0x9b   : > { %v603_v14 = vadd.f32 %v1639_v9, %v602_v8 }
  0xa2   : > { %v605_v10 = vpop.f32.mrf.mxu1  ;;  %v640_v33 = vpop.f32.mrf.mxu2 }
  0xa3   : > { %v606_v11 = vadd.f32 %v1639_v9, %v605_v10  ;;  %v641_v36 = vadd.f32 %v1641_v34, %v640_v33 }
  0xa5   : > { %1526 = vmatpush.xpose.msk.msra.mxu3 %vm646_vm2, %v606_v11 }
  0xa9   : > { %1527 = vmatpush.xpose.msk.msra.mxu3 %vm646_vm2, %v603_v14 }
  0xaa   : > { %v643_v35 = vpop.f32.mrf.mxu2  ;;  %v830_v14 = vpop.f32.mrf.mxu1 }
  0xab   : > { %v644_v37 = vadd.f32 %v1641_v34, %v643_v35  ;;  %v831_v18 = vadd.f32 %v1644_v16, %v830_v14 }
  0xac   : > { %1528 = vmatmul.msk.f32.vlgmr.msra.gmra.mxu3 %vm646_vm2, %v1921_v15 }
  0xad   : > { %717 = vmatpush.msrb.mxu0 %v644_v37  ;;  %750 = vmatpush.msrb.mxu3 %v1531_v41 }
  0xaf   : > { %718 = vmatpush.msrb.mxu0 %v641_v36  ;;  %751 = vmatpush.msrb.mxu3 %v1530_v42  ;;  %v1645_v42 = vld [vmem:[%s2191_s6 + $0x2] ss:$0 sm:$0xff] }
  0xb1   : > { %786 = vmatpush.msra.mxu0 %v1536_v38 }
  0xb2   : > { %v833_v17 = vpop.f32.mrf.mxu1 }
  0xb3   : > { %787 = vmatpush.msra.mxu0 %v1535_v39  ;;  %v834_v20 = vadd.f32 %v1644_v16, %v833_v17 }
  0xb4   : > { %1533 = vmatmul.msk.f32.vlgmr.msrb.gmra.mxu3 %vm545_vm0, %v1902_v5 }
  0xb5   : > { %788 = vmatpush.msra.mxu0 %v1534_v40  ;;  %906 = vmatpush.msra.mxu3 %v834_v20 }
  0xb7   : > { %907 = vmatpush.msra.mxu3 %v831_v18 }
  0xb9   : > { %975 = vmatpush.msrb.mxu3 %v1556_v21 }
  0xbb   : > { %976 = vmatpush.msrb.mxu3 %v1555_v22 }
 0x12f   : > { %v673_v24 = vpop.f32.mrf.mxu3 }
 0x130   : > { %v674_v25 = vadd.f32 %v673_v24, %v1942_v23  ;;  %v1554_v24 = vld [vmem:[%s2190_s5 + $0x30] sm:$0xff] }
 0x131   : > { %977 = vmatpush.msrb.mxu3 %v1554_v24 }
 0x132   : > { %v676_v26 = vsel %vm545_vm0, %v674_v25, -inf }
 0x133   : > { %677 = vmax.xlane.f32.xlu0 %v676_v26  ;;  %v1551_v26 = vld [vmem:[%s2188_s3 + $0x28] sm:$0xff] }
 0x137   : > { %v753_v61 = vpop.f32.mrf.mxu3 }
 0x138   : > { %v1985_v63 = vadd.f32 %v1643_v60, %v753_v61 }
 0x1a6   : > { %v678_v28 = vpop.xlane.xlu0 %677 }
 0x1a7   : > { %v679_v29 = vsub.f32 %v674_v25, %v678_v28  ;;  %v1550_v28 = vld [vmem:[%s2188_s3 + $0x20] sm:$0xff] }
 0x1a9   : > { %v680_v30 = vmul.f32 1.442695, %v679_v29 }
 0x1ab   : > { %1656 = vpow2.f32 %v680_v30 }
 0x1b1   : > { %v1657_v31 = vpop.eup %1656 }
 0x1b2   : > { %v682_v32 = vsel %vm545_vm0, %v1657_v31, 0.0 }
 0x1b3   : > { %683 = vadd.xlane.f32.xlu0 %v682_v32 }
 0x226   : > { %v684_v43 = vpop.xlane.xlu0 %683 }
 0x227   : > { %1658 = vrcp.f32 %v684_v43  ;;  %v696_v47 = vand.u32 2147483648, %v684_v43  ;;  %v694_v49 = vand.u32 2147483647, %v684_v43  ;;  %vm690_vm5 = vweird.f32 %v684_v43 }
 0x229   : > { %v697_v51 = vor.u32 1.1754944e-38, %v696_v47  ;;  %vm695_vm7 = vcmp.eq.f32.partialorder %v694_v49, 8.507059e+37  ;;  %v1562_v49 = vld [vmem:[%s2192_s7 + $0x40] sm:$0xff] }
 0x22d   : > { %v1659_v44 = vpop.eup %1658 }
 0x22e   : > { %v686_v45 = vmul.f32 %v1659_v44, %v684_v43  ;;  %vm691_vm4 = vweird.f32 %v1659_v44 }
 0x22f   : > { %vm692_vm6 = vmor %vm690_vm5, %vm691_vm4 }
 0x230   : > { %v687_v46 = vsub.f32 1.0, %v686_v45  ;;  %v1646_v45 = vld [vmem:[%s2189_s4 + $0x2] ss:$0 sm:$0xff] }
 0x232   : > { %v688_v48 = vmul.f32 %v1659_v44, %v687_v46 }
 0x234   : > { %v689_v50 = vadd.f32 %v1659_v44, %v688_v48 }
 0x236   : > { %v693_v52 = vsel %vm692_vm6, %v1659_v44, %v689_v50  ;;  %v1561_v50 = vld [vmem:[%s2192_s7 + $0x38] sm:$0xff] }
 0x237   : > { %v698_v53 = vsel %vm695_vm7, %v697_v51, %v693_v52  ;;  %v1560_v51 = vld [vmem:[%s2192_s7 + $0x30] sm:$0xff]  ;;  %vm1308_vm7 = vcmask 261120  }
 0x238   : > { %v699_v54 = vmul.f32 %v1657_v31, %v698_v53 }
 0x23a   : > { %1529 = vmatmul.msk.f32.vlgmr.msrb.gmra.mxu0 %vm545_vm0, %v699_v54 }
 0x23b   : > { %1015 = vmatpush.msrb.mxu0 %v1562_v49 }
 0x23d   : > { %1016 = vmatpush.msrb.mxu0 %v1561_v50 }
 0x23f   : > { %1017 = vmatpush.msrb.mxu0 %v1560_v51 }
 0x242   : > { %1538 = vmatmul.msk.f32.vlgmr.msra.gmra.mxu0 %vm578_vm1, %v1904_v6 }
 0x24a   : > { %1539 = vmatmul.msk.f32.gmra.mxu0 %vm578_vm1, %v1910_v7 }
 0x252   : > { %1564 = vmatmul.msk.f32.vlgmr.msrb.gmra.mxu0 %vm578_vm1, %v1938_v19 }
 0x25a   : > { %1565 = vmatmul.msk.f32.gmra.mxu0 %vm578_vm1, %v1946_v27 }
 0x2b7   : > { %v1976_v55 = vpop.f32.mrf.mxu0 }
 0x2bf   : > { %v790_v56 = vpop.f32.mrf.mxu0 }
 0x2c0   : > { %v791_v62 = vadd.f32 %v1642_v57, %v790_v56 }
 0x2c7   : > { %v793_v58 = vpop.f32.mrf.mxu0 }
 0x2c8   : > { %v794_v59 = vadd.f32 %v1642_v57, %v793_v58 }
 0x2ca   : > { %1546 = vmatpush.xpose.msk.msrb.mxu2 %vm646_vm2, %v794_v59 }
 0x2ce   : > { %1547 = vmatpush.xpose.msk.msrb.mxu2 %vm646_vm2, %v791_v62 }
 0x2cf   : > { %v1019_v62 = vpop.f32.mrf.mxu0 }
 0x2d0   : > { %v1020_v2 = vadd.f32 %v1647_v0, %v1019_v62 }
 0x2d1   : > { %1548 = vmatmul.msk.f32.vlgmr.msrb.gmra.mxu2 %vm646_vm2, %v1985_v63 }
 0x2d2   : > { %939 = vmatpush.msra.mxu2 %v1551_v26 }
 0x2d4   : > { %940 = vmatpush.msra.mxu2 %v1550_v28  ;;  %v1648_v28 = vld [vmem:[%s2191_s6 + $0x3] ss:$0 sm:$0xff] }
 0x2d7   : > { %v1022_v1 = vpop.f32.mrf.mxu0 }
 0x2d9   : > { %1553 = vmatmul.msk.f32.vlgmr.msra.gmra.mxu2 %vm545_vm0, %v1902_v5 }
 0x354   : > { %v862_v3 = vpop.f32.mrf.mxu2 }
 0x355   : > { %v863_v4 = vadd.f32 %v862_v3, %v1942_v23  ;;  %v1023_v3 = vadd.f32 %v1647_v0, %v1022_v1  ;;  %v723_v0 = vadd.f32 %v1976_v55, %v1921_v15 }
 0x357   : > { %v865_v8 = vsel %vm545_vm0, %v863_v4, -inf  ;;  %1095 = vmatpush.msrb.mxu2 %v1023_v3 }
 0x358   : > { %866 = vmax.xlane.f32.xlu1 %v865_v8  ;;  %v1574_v8 = vld [vmem:[%s2190_s5 + $0x48] sm:$0xff] }
 0x359   : > { %1096 = vmatpush.msrb.mxu2 %v1020_v2 }
 0x35c   : > { %v942_v46 = vpop.f32.mrf.mxu2 }
 0x35d   : > { %v2038_v48 = vadd.f32 %v1646_v45, %v942_v46 }
 0x3cb   : > { %v867_v9 = vpop.xlane.xlu1 %866 }
 0x3cc   : > { %v868_v10 = vsub.f32 %v863_v4, %v867_v9  ;;  %v1576_v4 = vld [vmem:[%s2190_s5 + $0x58] sm:$0xff] }
 0x3cd   : > { %1164 = vmatpush.msra.mxu2 %v1576_v4 }
 0x3ce   : > { %v869_v11 = vmul.f32 1.442695, %v868_v10  ;;  %v1571_v10 = vld [vmem:[%s2188_s3 + $0x38] sm:$0xff] }
 0x3d0   : > { %1660 = vpow2.f32 %v869_v11  ;;  %v1570_v11 = vld [vmem:[%s2188_s3 + $0x30] sm:$0xff] }
 0x3d6   : > { %v1661_v12 = vpop.eup %1660 }
 0x3d7   : > { %v871_v13 = vsel %vm545_vm0, %v1661_v12, 0.0 }
 0x3d8   : > { %872 = vadd.xlane.f32.xlu1 %v871_v13 }
 0x44b   : > { %v873_v25 = vpop.xlane.xlu1 %872 }
 0x44c   : > { %1662 = vrcp.f32 %v873_v25  ;;  %v885_v32 = vand.u32 2147483648, %v873_v25  ;;  %v883_v34 = vand.u32 2147483647, %v873_v25  ;;  %vm879_vm9 = vweird.f32 %v873_v25 }
 0x44e   : > { %v886_v36 = vor.u32 1.1754944e-38, %v885_v32  ;;  %vm884_vm11 = vcmp.eq.f32.partialorder %v883_v34, 8.507059e+37  ;;  %v1581_v34 = vld [vmem:[%s2192_s7 + $0x50] sm:$0xff] }
 0x452   : > { %v1663_v29 = vpop.eup %1662 }
 0x453   : > { %v875_v30 = vmul.f32 %v1663_v29, %v873_v25  ;;  %vm880_vm8 = vweird.f32 %v1663_v29 }
 0x454   : > { %vm881_vm10 = vmor %vm879_vm9, %vm880_vm8 }
 0x455   : > { %v876_v31 = vsub.f32 1.0, %v875_v30 }
 0x457   : > { %v877_v33 = vmul.f32 %v1663_v29, %v876_v31  ;;  %v1649_v31 = vld [vmem:[%s2189_s4 + $0x3] ss:$0 sm:$0xff] }
 0x459   : > { %v878_v35 = vadd.f32 %v1663_v29, %v877_v33 }
 0x45b   : > { %v882_v37 = vsel %vm881_vm10, %v1663_v29, %v878_v35  ;;  %v1580_v35 = vld [vmem:[%s2192_s7 + $0x48] sm:$0xff] }
 0x45c   : > { %v887_v38 = vsel %vm884_vm11, %v886_v36, %v882_v37 }
 0x45d   : > { %v888_v39 = vmul.f32 %v1661_v12, %v887_v38 }
 0x45f   : > { %1549 = vmatmul.msk.f32.vlgmr.msra.gmra.mxu3 %vm545_vm0, %v888_v39 }
 0x467   : > { %1558 = vmatmul.msk.f32.vlgmr.msrb.gmra.mxu3 %vm578_vm1, %v1904_v6 }
 0x46f   : > { %1559 = vmatmul.msk.f32.gmra.mxu3 %vm578_vm1, %v1910_v7 }
 0x4e2   : > { %v909_v40 = vpop.f32.mrf.mxu3 }
 0x4e3   : > { %v912_v61 = vadd.f32 %v909_v40, %v1985_v63  ;;  %v1575_v63 = vld [vmem:[%s2190_s5 + $0x50] sm:$0xff] }
 0x4e4   : > { %1165 = vmatpush.msra.mxu2 %v1575_v63 }
 0x4e6   : > { %1166 = vmatpush.msra.mxu2 %v1574_v8 }
 0x4ea   : > { %v979_v41 = vpop.f32.mrf.mxu3 }
 0x4eb   : > { %v980_v47 = vadd.f32 %v1645_v42, %v979_v41 }
 0x4f2   : > { %v982_v43 = vpop.f32.mrf.mxu3 }
 0x4f3   : > { %v983_v44 = vadd.f32 %v1645_v42, %v982_v43 }
 0x4f5   : > { %1566 = vmatpush.xpose.msk.msra.mxu1 %vm646_vm2, %v983_v44 }
 0x4f9   : > { %1567 = vmatpush.xpose.msk.msra.mxu1 %vm646_vm2, %v980_v47 }
 0x4fc   : > { %1568 = vmatmul.msk.f32.vlgmr.msra.gmra.mxu1 %vm646_vm2, %v2038_v48 }
 0x4fd   : > { %1128 = vmatpush.msrb.mxu1 %v1571_v10 }
 0x4ff   : > { %1129 = vmatpush.msrb.mxu1 %v1570_v11 }
 0x504   : > { %1573 = vmatmul.msk.f32.vlgmr.msrb.gmra.mxu1 %vm545_vm0, %v1902_v5 }
 0x579   : > { %v1051_v52 = vpop.f32.mrf.mxu1 }
 0x57a   : > { %v1052_v53 = vadd.f32 %v1051_v52, %v1942_v23 }
 0x57c   : > { %v1054_v54 = vsel %vm545_vm0, %v1052_v53, -inf }
 0x57d   : > { %1055 = vmax.xlane.f32.xlu2 %v1054_v54 }
 0x581   : > { %v1131_v32 = vpop.f32.mrf.mxu1 }
 0x5f0   : > { %v1056_v56 = vpop.xlane.xlu2 %1055 }
 0x5f1   : > { %v1057_v57 = vsub.f32 %v1052_v53, %v1056_v56 }
 0x5f3   : > { %v1058_v58 = vmul.f32 1.442695, %v1057_v57 }
 0x5f5   : > { %1664 = vpow2.f32 %v1058_v58 }
 0x5fb   : > { %v1665_v59 = vpop.eup %1664 }
 0x5fc   : > { %v1060_v60 = vsel %vm545_vm0, %v1665_v59, 0.0 }
 0x5fd   : > { %1061 = vadd.xlane.f32.xlu2 %v1060_v60 }
 0x615   : > { %1292 = vrot.lane.b32.xlu2 %v912_v61, %s1743_s27  ;;  %s1413_s27 = scalar_lea.sflag [#allocation3], %s515_s29 }
 0x670   : > { %v1062_v9 = vpop.xlane.xlu2 %1061 }
 0x671   : > { %1666 = vrcp.f32 %v1062_v9  ;;  %v1074_v16 = vand.u32 2147483648, %v1062_v9  ;;  %v1072_v18 = vand.u32 2147483647, %v1062_v9  ;;  %vm1068_vm13 = vweird.f32 %v1062_v9 }
 0x673   : > { %v1075_v21 = vor.u32 1.1754944e-38, %v1074_v16  ;;  %vm1073_vm15 = vcmp.eq.f32.partialorder %v1072_v18, 8.507059e+37 }
 0x677   : > { %v1667_v12 = vpop.eup %1666 }
 0x678   : > { %v1064_v13 = vmul.f32 %v1667_v12, %v1062_v9  ;;  %vm1069_vm12 = vweird.f32 %v1667_v12  ;;  %v1293_v62 = vpop.permute.xlu2 %1292  ;;  %v1746_v9 = vmov 32.0  }
 0x679   : > { %vm1070_vm14 = vmor %vm1068_vm13, %vm1069_vm12  ;;  %v1303_v2 = vsel %vm646_vm2, %v723_v0, %v1293_v62 }
 0x67a   : > { %v1065_v14 = vsub.f32 1.0, %v1064_v13 }
 0x67c   : > { %v1066_v17 = vmul.f32 %v1667_v12, %v1065_v14 }
 0x67e   : > { %v1067_v20 = vadd.f32 %v1667_v12, %v1066_v17 }
 0x680   : > { %v1071_v22 = vsel %vm1070_vm14, %v1667_v12, %v1067_v20 }
 0x681   : > { %v1076_v24 = vsel %vm1073_vm15, %v1075_v21, %v1071_v22  ;;  %v1349_v21 = vld [vmem:[%s2194_s9 + $0x18] sm:$0xff]  ;;  %v1348_v22 = vld [vmem:[%s2194_s9 + $0x10] sm:$0xff] }
 0x682   : > { %v1077_v25 = vmul.f32 %v1665_v59, %v1076_v24  ;;  %v1347_v24 = vld [vmem:[%s2194_s9 + $0x8] sm:$0xff] }
 0x684   : > { %1569 = vmatmul.msk.f32.vlgmr.msrb.gmra.mxu2 %vm545_vm0, %v1077_v25  ;;  %v1346_v25 = vld [vmem:[%s2194_s9] sm:$0xff] }
 0x68c   : > { %1578 = vmatmul.msk.f32.vlgmr.msra.gmra.mxu2 %vm578_vm1, %v1904_v6  ;;  %v1132_v6 = vadd.f32 %v1649_v31, %v1131_v32 }
 0x694   : > { %1579 = vmatmul.msk.f32.gmra.mxu2 %vm578_vm1, %v1910_v7  ;;  %v1582_v7 = vld [vmem:[%s2192_s7 + $0x58] sm:$0xff] }
 0x695   : > { %1204 = vmatpush.msra.mxu3 %v1582_v7  ;;  %v1651_v7 = vld [vmem:[%s2196_s11] ss:$0 sm:$0xff] }
 0x697   : > { %1205 = vmatpush.msra.mxu3 %v1581_v34 }
 0x699   : > { %1206 = vmatpush.msra.mxu3 %v1580_v35 }
 0x69a   : > { %1584 = vmatmul.msk.f32.vlgmr.msra.gmra.mxu3 %vm578_vm1, %v1938_v19 }
 0x6a2   : > { %1585 = vmatmul.msk.f32.gmra.mxu3 %vm578_vm1, %v1946_v27 }
 0x707   : > { %v1098_v5 = vpop.f32.mrf.mxu2 }
 0x708   : > { %v1101_v39 = vadd.f32 %v1098_v5, %v2038_v48 }
 0x70f   : > { %v1168_v26 = vpop.f32.mrf.mxu2 }
 0x710   : > { %v1169_v33 = vadd.f32 %v1648_v28, %v1168_v26 }
 0x717   : > { %v1171_v29 = vpop.f32.mrf.mxu2 }
 0x718   : > { %v1172_v30 = vadd.f32 %v1648_v28, %v1171_v29 }
 0x71a   : > { %1586 = vmatpush.xpose.msk.msra.mxu0 %vm646_vm2, %v1172_v30 }
 0x71d   : > { %v1208_v44 = vpop.f32.mrf.mxu3 }
 0x71e   : > { %1587 = vmatpush.xpose.msk.msra.mxu0 %vm646_vm2, %v1169_v33 }
 0x721   : > { %1588 = vmatmul.msk.f32.vlgmr.msra.gmra.mxu0 %vm646_vm2, %v1132_v6 }
 0x722   : > { %1369 = vmatpush.msrb.mxu0 %v1349_v21 }
 0x724   : > { %1370 = vmatpush.msrb.mxu0 %v1348_v22 }
 0x725   : > { %v1211_v45 = vpop.f32.mrf.mxu3 }
 0x726   : > { %1371 = vmatpush.msrb.mxu0 %v1347_v24 }
 0x728   : > { %1372 = vmatpush.msrb.mxu0 %v1346_v25 }
 0x79e   : > { %v1240_v36 = vpop.f32.mrf.mxu0 }
 0x79f   : > { %v1241_v37 = vadd.f32 %v1240_v36, %v1942_v23  ;;  %v1650_v23 = vld [vmem:[%s2193_s8 + $0x3] ss:$0 sm:$0xff]  ;;  %v1652_v36 = vld [vmem:[%s2197_s12] ss:$0 sm:$0xff] }
 0x7a0   : > { %v1209_v46 = vadd.f32 %v1650_v23, %v1208_v44  ;;  %v1212_v27 = vadd.f32 %v1650_v23, %v1211_v45 }
 0x7a1   : > { %v1243_v38 = vsel %vm545_vm0, %v1241_v37, -inf }
 0x7a2   : > { %1244 = vmax.xlane.f32.xlu0 %v1243_v38  ;;  %1284 = vmatpush.msra.mxu1 %v1212_v27 }
 0x7a4   : > { %1285 = vmatpush.msra.mxu1 %v1209_v46 }
 0x7b6   : > { %1296 = vrot.lane.b32.xlu0 %v1101_v39, %s1744_s16  ;;  %v1653_v39 = vld [vmem:[%s2195_s10] ss:$0 sm:$0xff] }
 0x815   : > { %v1245_v40 = vpop.xlane.xlu0 %1244 }
 0x816   : > { %v1246_v41 = vsub.f32 %v1241_v37, %v1245_v40 }
 0x818   : > { %v1247_v42 = vmul.f32 1.442695, %v1246_v41 }
 0x81a   : > { %1668 = vpow2.f32 %v1247_v42 }
 0x820   : > { %v1669_v43 = vpop.eup %1668 }
 0x821   : > { %v1249_v19 = vsel %vm545_vm0, %v1669_v43, 0.0 }
 0x822   : > { %1250 = vadd.xlane.f32.xlu1 %v1249_v19 }
 0x828   : > { %v1297_v1 = vpop.permute.xlu0 %1296 }
 0x829   : > { %v1304_v3 = vsel %vm545_vm0, %v1303_v2, %v1297_v1 }
 0x895   : > { %v1251_v47 = vpop.xlane.xlu1 %1250 }
 0x896   : > { %1670 = vrcp.f32 %v1251_v47  ;;  %v1263_v51 = vand.u32 2147483648, %v1251_v47  ;;  %v1261_v53 = vand.u32 2147483647, %v1251_v47  ;;  %vm1257_vm4 = vweird.f32 %v1251_v47 }
 0x897   : > { %1672 = vrcp.f32 %v1746_v9 }
 0x898   : > { %v1264_v56 = vor.u32 1.1754944e-38, %v1263_v51  ;;  %vm1262_vm6 = vcmp.eq.f32.partialorder %v1261_v53, 8.507059e+37 }
 0x89c   : > { %v1671_v48 = vpop.eup %1670 }
 0x89d   : > { %v1253_v49 = vmul.f32 %v1671_v48, %v1251_v47  ;;  %vm1258_vm3 = vweird.f32 %v1671_v48  ;;  %v1673_v10 = vpop.eup %1672 }
 0x89e   : > { %vm1259_vm5 = vmor %vm1257_vm4, %vm1258_vm3  ;;  %v1313_v11 = vmul.f32 32.0, %v1673_v10  ;;  %vm1317_vm8 = vweird.f32 %v1673_v10 }
 0x89f   : > { %v1254_v50 = vsub.f32 1.0, %v1253_v49 }
 0x8a0   : > { %v1314_v12 = vsub.f32 1.0, %v1313_v11 }
 0x8a1   : > { %v1255_v52 = vmul.f32 %v1671_v48, %v1254_v50 }
 0x8a2   : > { %v1315_v13 = vmul.f32 %v1673_v10, %v1314_v12 }
 0x8a3   : > { %v1256_v54 = vadd.f32 %v1671_v48, %v1255_v52 }
 0x8a4   : > { %v1316_v14 = vadd.f32 %v1673_v10, %v1315_v13 }
 0x8a5   : > { %v1260_v57 = vsel %vm1259_vm5, %v1671_v48, %v1256_v54 }
 0x8a6   : > { %v1265_v58 = vsel %vm1262_vm6, %v1264_v56, %v1260_v57  ;;  %v1318_v15 = vsel %vm1317_vm8, %v1673_v10, %v1316_v14  ;;  %v1654_v57 = vld [vmem:[%s2198_s13] ss:$0 sm:$0xff] }
 0x8a7   : > { %v1266_v59 = vmul.f32 %v1669_v43, %v1265_v58 }
 0x8a9   : > { %1589 = vmatmul.msk.f32.vlgmr.msra.gmra.mxu1 %vm545_vm0, %v1266_v59 }
 0x926   : > { %v1287_v60 = vpop.f32.mrf.mxu1 }
 0x927   : > { %v1290_v61 = vadd.f32 %v1287_v60, %v1132_v6  ;;  %v1655_v60 = vld [vmem:[%s2199_s14] ss:$0 sm:$0xff] }
 0x929   : > { %1300 = vrot.lane.b32.xlu1 %v1290_v61, %s1745_s26  ;;  %s1423_s26 = scalar_lea.hbm %s2200_s15, %s1592_s18 }
 0x92a   : > { %s1427_s0 = sshll.u32 %s1423_s26, 4  ;;  %s1428_s0 = int_to_ptr.hbm [resolvable:$true] %s1427_s0 }
 0x92b   : > { %s1692_s16 = sshra.s32 %s1428_s0, 4  ;;  %s1693_s16 = int_to_ptr.hbm [resolvable:$true] %s1692_s16 }
 0x92c   : > { %s1694_s18 = scalar_lea.hbm %s1693_s16, 8  ;;  %p1699_p1 = scmp.lt.s32.totalorder %s1693_s16, %s2200_s15 }
 0x92d   : > { %p1695_p12 = scmp.ne.s32.totalorder %s1693_s16, %s1694_s18  ;;  %p1700_p2 = scmp.lt.s32.totalorder %s1698_s25, %s1694_s18 }
 0x92f   : > { %p1696_p13 = pnand %p1695_p12, %p1865_p5  ;;  %p1701_p3 = por %p1700_p2, %p1699_p1 }
 0x931   : > { %p1697_p0 = pneg %p1696_p13 }
 0x933   : > { %p1702_p4 = pnand %p1701_p3, %p1697_p0 }
 0x99b   : > { %v1301_v4 = vpop.permute.xlu1 %1300 }
 0x99c   : > { %v1305_v63 = vsel %vm578_vm1, %v1304_v3, %v1301_v4 }
 0x99d   : > { %v1309_v8 = vsel %vm1308_vm7, %v1305_v63, 0.0 }
 0x99e   : > { %1310 = vadd.xlane.f32.xlu2 %v1309_v8 }
 0xa11   : > { %v1311_v55 = vpop.xlane.xlu2 %1310 }
 0xa12   : > { %v1319_v16 = vmul.f32 %v1318_v15, %v1311_v55 }
 0xa14   : > { %v1320_v17 = vsub.f32 %v1305_v63, %v1319_v16 }
 0xa16   : > { %v1321_v18 = vmul.f32 %v1320_v17, %v1320_v17 }
 0xa18   : > { %v1322_v20 = vsel %vm1308_vm7, %v1321_v18, 0.0 }
 0xa19   : > { %1323 = vadd.xlane.f32.xlu0 %v1322_v20 }
 0xa8c   : > { %v1324_v5 = vpop.xlane.xlu0 %1323 }
 0xa8d   : > { %v1325_v26 = vmul.f32 %v1324_v5, %v1318_v15 }
 0xa8f   : > { %v1326_v28 = vadd.f32 1e-05, %v1325_v26 }
 0xa91   : > { %1674 = vrsqrt.f32 %v1326_v28  ;;  %vm1333_vm1 = vweird.f32 %v1326_v28 }
 0xa97   : > { %v1675_v29 = vpop.eup %1674 }
 0xa98   : > { %v1328_v30 = vmul.f32 %v1675_v29, %v1326_v28  ;;  %vm1334_vm0 = vweird.f32 %v1675_v29 }
 0xa99   : > { %vm1335_vm2 = vmor %vm1333_vm1, %vm1334_vm0 }
 0xa9a   : > { %v1329_v31 = vmul.f32 %v1675_v29, %v1328_v30 }
 0xa9c   : > { %v1330_v32 = vmul.f32 0.5, %v1329_v31 }
 0xa9e   : > { %v1331_v33 = vsub.f32 1.5, %v1330_v32 }
 0xaa0   : > { %v1332_v6 = vmul.f32 %v1675_v29, %v1331_v33 }
 0xaa2   : > { %v1336_v34 = vsel %vm1335_vm2, %v1675_v29, %v1332_v6 }
 0xaa3   : > { %v1337_v35 = vmul.f32 %v1336_v34, %v1320_v17 }
 0xaa5   : > { %v1341_v37 = vmul.f32 %v1651_v7, %v1337_v35 }
 0xaa7   : > { %v1345_v38 = vadd.f32 %v1652_v36, %v1341_v37 }
 0xaa9   : > { %1590 = vmatmul.msk.f32.vlgmr.msrb.gmra.mxu0 %vm1308_vm7, %v1345_v38 }
 0xb26   : > { %v1374_v40 = vpop.f32.mrf.mxu0 }
 0xb27   : > { %v1375_v41 = vadd.f32 %v1653_v39, %v1374_v40 }
 0xb29   : > { %v1377_v42 = vmax.f32 %v1375_v41, 0.0 }
 0xb2b   : > { %v1378_v43 = vadd.f32 %v1377_v42, %v1345_v38 }
 0xb2d   : > { %v1381_v19 = vsel %vm1308_vm7, %v1378_v43, 0.0 }
 0xb2e   : > { %1382 = vadd.xlane.f32.xlu1 %v1381_v19 }
 0xba1   : > { %v1383_v44 = vpop.xlane.xlu1 %1382 }
 0xba2   : > { %v1384_v23 = vmul.f32 %v1383_v44, %v1318_v15 }
 0xba4   : > { %v1385_v45 = vsub.f32 %v1378_v43, %v1384_v23 }
 0xba6   : > { %v1386_v46 = vmul.f32 %v1385_v45, %v1385_v45 }
 0xba8   : > { %v1387_v27 = vsel %vm1308_vm7, %v1386_v46, 0.0 }
 0xba9   : > { %1388 = vadd.xlane.f32.xlu2 %v1387_v27 }
 0xc1c   : > { %v1389_v47 = vpop.xlane.xlu2 %1388 }
 0xc1d   : > { %v1390_v48 = vmul.f32 %v1389_v47, %v1318_v15 }
 0xc1f   : > { %v1391_v49 = vadd.f32 1e-05, %v1390_v48 }
 0xc21   : > { %1676 = vrsqrt.f32 %v1391_v49  ;;  %vm1398_vm10 = vweird.f32 %v1391_v49 }
 0xc27   : > { %v1677_v50 = vpop.eup %1676 }
 0xc28   : > { %v1393_v51 = vmul.f32 %v1677_v50, %v1391_v49  ;;  %vm1399_vm9 = vweird.f32 %v1677_v50 }
 0xc29   : > { %vm1400_vm11 = vmor %vm1398_vm10, %vm1399_vm9 }
 0xc2a   : > { %v1394_v52 = vmul.f32 %v1677_v50, %v1393_v51 }
 0xc2c   : > { %v1395_v53 = vmul.f32 0.5, %v1394_v52 }
 0xc2e   : > { %v1396_v54 = vsub.f32 1.5, %v1395_v53 }
 0xc30   : > { %v1397_v56 = vmul.f32 %v1677_v50, %v1396_v54 }
 0xc32   : > { %v1401_v58 = vsel %vm1400_vm11, %v1677_v50, %v1397_v56 }
 0xc33   : > { %v1402_v59 = vmul.f32 %v1401_v58, %v1385_v45 }
 0xc35   : > { %v1406_v61 = vmul.f32 %v1654_v57, %v1402_v59 }
 0xc37   : > { %v1410_v62 = vadd.f32 %v1655_v60, %v1406_v61 }
 0xc39   : > { %1411 = vst.msk [vmem:[%s517_s30] sm:$0xff] %vm1308_vm7, %v1410_v62 }
 0xc3a   : > { %1705 = shalt.err (!%p1702_p4)
}
 0xc3b   : > { %1595 = dma.vmem_to_hbm [thread:$0]  (%p1865_p5), %s1426_s22, 128, %s1428_s0, %s1413_s27  }
 0xc3c PF: > { %s2215_s29 = sld [smem:[#allocation5_spill]]  ;;  %p1601_p7 = scmp.ge.s32.totalorder %s1740_s21, 2 }
 0xc3e   : > { %p1598_p8 = pnand %p1601_p7, %p1869_p6 }
 0xc40   : > { %p1599_p9 = pneg %p1598_p8 }
 0xc42   : > { %s1439_s30 = sand.u32 1, %s2215_s29  }
 0xc43   : > { %s1440_s17 = scalar_lea.sflag [#allocation3], %s1439_s30 }
 0xc44   : > { %1723 = dma.done.wait (%p1599_p9), %s1440_s17, 128  }
 0xc45   : > { %1725 = vsyncadd (%p1599_p9), %s1440_s17, 4294967168  ;;  %s2217_s21 = sld [smem:[#allocation7_spill]]  ;;  %s2220_s18 = smov %s1732_s19 }
 0xc46   : > { %s2218_s16 = sld [smem:[#allocation6_spill]] }
 0xc47   : > { %s2219_s20 = sld [smem:[#allocation8_spill]] }
 0xc4b   : > { %p25_p10 = scmp.ge.s32.totalorder %s2217_s21, 4  }
 0xc4c   : > { %s2221_s19 = smov %s2218_s16 }
 0xc4d   :  { %27 = sbr.rel (!%p25_p10) target bundleno = 5 (0x5), region = 139 }
 0xc52   :  { %1446 = vsyncpa [#allocation3], 1 }
 0xc53   :  { %1448 = vsyncpa [#allocation3 + $0x1], 1 }

</bundles_post_ra>
